<compile_context>
chip_gen: v6e
topology: v6e:2x2x1
jax: 0.10.0
libtpu: 0.0.40
codegen_flags: <defaults>
</compile_context>

<pallas_src>
import functools

import jax
import jax.numpy as jnp
from jax.experimental import pallas as pl
from jax.experimental.pallas import tpu as pltpu


# ----------------------------- in-kernel helpers ------------------------------


def _erf(x):
    # Abramowitz & Stegun 7.1.26 polynomial erf, |err| < 1.5e-7 (lax.erf has no
    # guaranteed Mosaic lowering; exp/abs/select do).
    a1, a2, a3, a4, a5 = (0.254829592, -0.284496736, 1.421413741,
                          -1.453152027, 1.061405429)
    p = 0.3275911
    sgn = jnp.where(x < 0.0, -1.0, 1.0)
    z = jnp.abs(x)
    t = 1.0 / (1.0 + p * z)
    poly = ((((a5 * t + a4) * t + a3) * t + a2) * t + a1) * t
    return sgn * (1.0 - poly * jnp.exp(-z * z))


def _gelu_exact(x):
    # PyTorch nn.GELU default (exact erf form). tanh-GELU would shift work from the
    # VPU to the EUP slot — only worth it if the VPU slot saturates at real sizes.
    return 0.5 * x * (1.0 + _erf(x * 0.7071067811865476))


# ----------------------------- fused forward kernel ------------------------------


def _bert_forward_kernel(
    emb_ref, mask_ref,
    eln_g_ref, eln_b_ref,
    wqkv_ref, bqkv_ref, wo_ref, bo_ref, ln1_g_ref, ln1_b_ref,
    wi_ref, bi_ref, wp_ref, bp_ref, ln2_g_ref, ln2_b_ref,
    pool_w_ref, pool_b_ref, cls_w_ref, cls_b_ref,
    logits_ref,
    *, B, S, H, nH, L, eps,
):
    Dh = H // nH
    scale = 1.0 / (Dh ** 0.5)

    def ln(x, g, b):
        mu = jnp.mean(x, axis=-1, keepdims=True)
        xc = x - mu
        var = jnp.mean(xc * xc, axis=-1, keepdims=True)
        return xc * jax.lax.rsqrt(var + eps) * g + b

    def mm(x, w):  # bf16 MXU operands, f32 accumulation (one cast per use-site)
        return jnp.dot(x.astype(jnp.bfloat16), w,
                       preferred_element_type=jnp.float32)

    # ---- hoisted additive attention mask (built ONCE; JAX doesn't CSE broadcasts) ----
    mask = mask_ref[...]                                          # (B, S), 0 / -10000
    # batched-head layout: batch index = head*B + b  ->  (nH*B, 1, S)
    mask_b = jnp.concatenate([mask] * nH, axis=0)[:, None, :]

    # ---- embedding LayerNorm ----
    h = ln(emb_ref[...], eln_g_ref[...], eln_b_ref[...])          # (B*S, H) f32

    # ---- encoder layers (unrolled; weights VMEM-resident — see scaling notes) ----
    for l in range(L):
        # fused QKV projection -> (B*S, 3H), single bf16 cast of the result
        qkv = mm(h, wqkv_ref[l]) + bqkv_ref[l]
        qkv_bf = qkv.astype(jnp.bfloat16)

        def split_heads(base):
            # (nH*B, S, Dh) with batch index = head*B + b (matches mask_b ordering)
            return jnp.concatenate(
                [qkv_bf[:, base + hh * Dh: base + (hh + 1) * Dh].reshape(B, S, Dh)
                 for hh in range(nH)], axis=0)

        q = split_heads(0)
        k = split_heads(H)
        v = split_heads(2 * H)

        # single batched attention einsum pair per layer (all heads at once)
        s = jnp.einsum('bqd,bkd->bqk', q, k,
                       preferred_element_type=jnp.float32) * scale + mask_b
        s = s - jnp.max(s, axis=-1, keepdims=True)
        p = jnp.exp(s)
        p = p * pl.reciprocal(jnp.sum(p, axis=-1, keepdims=True), approx=True)
        ctx_hb = jnp.einsum('bqk,bkd->bqd', p.astype(jnp.bfloat16), v,
                            preferred_element_type=jnp.float32)    # (nH*B, S, Dh)

        # merge heads back to (B*S, H) with one lane-dim concat
        ctx = jnp.concatenate(
            [ctx_hb[hh * B:(hh + 1) * B].reshape(B * S, Dh) for hh in range(nH)],
            axis=-1)

        # output projection + residual + LayerNorm (fused epilogue)
        attn_out = mm(ctx, wo_ref[l]) + bo_ref[l]
        h1 = ln(attn_out + h, ln1_g_ref[l], ln1_b_ref[l])

        # FFN: exact GELU, then down-proj + residual + LayerNorm (fused epilogue)
        inter = _gelu_exact(mm(h1, wi_ref[l]) + bi_ref[l])
        ffn_out = mm(inter, wp_ref[l]) + bp_ref[l]
        h = ln(ffn_out + h1, ln2_g_ref[l], ln2_b_ref[l])

    # ---- pooler (tanh on CLS token) + classifier, fused ----
    cls_tok = h.reshape(B, S, H)[:, 0, :]                          # (B, H)
    pooled = jnp.tanh(mm(cls_tok, pool_w_ref[...]) + pool_b_ref[...])
    logits = mm(pooled, cls_w_ref[...]) + cls_b_ref[...]           # (B, 3)
    logits_ref[...] = logits.astype(logits_ref.dtype)


# ----------------------------- model / params ------------------------------


class Config:
    vocab_size = 50
    hidden_size = 32
    num_hidden_layers = 2
    num_attention_heads = 2
    intermediate_size = 64
    max_position_embeddings = 16
    type_vocab_size = 2
    layer_norm_eps = 1e-12


def init_params(cfg, key):
    """Deterministic synthetic BERT-style init (normal(0, 0.02))."""
    H, I = cfg.hidden_size, cfg.intermediate_size

    def dense(key, shape):
        return 0.02 * jax.random.normal(key, shape, dtype=jnp.float32)

    keys = iter(jax.random.split(key, 64))
    p = {
        "word_emb": dense(next(keys), (cfg.vocab_size, H)),
        "pos_emb": dense(next(keys), (cfg.max_position_embeddings, H)),
        "type_emb": dense(next(keys), (cfg.type_vocab_size, H)),
        "emb_ln_g": jnp.ones((H,), jnp.float32),
        "emb_ln_b": jnp.zeros((H,), jnp.float32),
        "layers": [],
        "pooler_w": dense(next(keys), (H, H)),
        "pooler_b": jnp.zeros((H,), jnp.float32),
        "cls_w": dense(next(keys), (H, 3)),
        "cls_b": jnp.zeros((3,), jnp.float32),
    }
    for _ in range(cfg.num_hidden_layers):
        p["layers"].append({
            "Wq": dense(next(keys), (H, H)), "bq": jnp.zeros((H,), jnp.float32),
            "Wk": dense(next(keys), (H, H)), "bk": jnp.zeros((H,), jnp.float32),
            "Wv": dense(next(keys), (H, H)), "bv": jnp.zeros((H,), jnp.float32),
            "Wo": dense(next(keys), (H, H)), "bo": jnp.zeros((H,), jnp.float32),
            "ln1_g": jnp.ones((H,), jnp.float32), "ln1_b": jnp.zeros((H,), jnp.float32),
            "Wi": dense(next(keys), (H, I)), "bi": jnp.zeros((I,), jnp.float32),
            "Wp": dense(next(keys), (I, H)), "bp": jnp.zeros((H,), jnp.float32),
            "ln2_g": jnp.ones((H,), jnp.float32), "ln2_b": jnp.zeros((H,), jnp.float32),
        })
    return p


def pack_params(params, cfg):
    """Stack per-layer weights, fuse Wq|Wk|Wv, cast matmul weights to bf16 (MXU-native)."""
    L, H, I = cfg.num_hidden_layers, cfg.hidden_size, cfg.intermediate_size
    layers = params["layers"]

    def stack(name):
        return jnp.stack([layers[l][name] for l in range(L)])

    wqkv = jnp.stack([
        jnp.concatenate([layers[l]["Wq"], layers[l]["Wk"], layers[l]["Wv"]], axis=1)
        for l in range(L)]).astype(jnp.bfloat16)                            # (L, H, 3H)
    bqkv = jnp.stack([
        jnp.concatenate([layers[l]["bq"], layers[l]["bk"], layers[l]["bv"]])
        for l in range(L)]).reshape(L, 1, 3 * H)                            # (L, 1, 3H)

    return {
        "word_emb": params["word_emb"],
        "pos_emb": params["pos_emb"],
        "type_emb": params["type_emb"],
        "emb_ln_g": params["emb_ln_g"].reshape(1, H),
        "emb_ln_b": params["emb_ln_b"].reshape(1, H),
        "wqkv": wqkv, "bqkv": bqkv,
        "wo": stack("Wo").astype(jnp.bfloat16), "bo": stack("bo").reshape(L, 1, H),
        "ln1_g": stack("ln1_g").reshape(L, 1, H), "ln1_b": stack("ln1_b").reshape(L, 1, H),
        "wi": stack("Wi").astype(jnp.bfloat16), "bi": stack("bi").reshape(L, 1, I),
        "wp": stack("Wp").astype(jnp.bfloat16), "bp": stack("bp").reshape(L, 1, H),
        "ln2_g": stack("ln2_g").reshape(L, 1, H), "ln2_b": stack("ln2_b").reshape(L, 1, H),
        "pool_w": params["pooler_w"].astype(jnp.bfloat16),
        "pool_b": params["pooler_b"].reshape(1, H),
        "cls_w": params["cls_w"].astype(jnp.bfloat16),
        "cls_b": params["cls_b"].reshape(1, 3),
    }


def sentiment_model_forward(packed, cfg, input_ids, attention_mask, token_type_ids):
    B, S = input_ids.shape
    H = cfg.hidden_size
    nH = cfg.num_attention_heads
    L = cfg.num_hidden_layers

    # Embedding gathers are JAX glue (tiny tables); everything else is one fused kernel.
    pos_ids = jnp.arange(S, dtype=jnp.int32)
    emb = (packed["word_emb"][input_ids]
           + packed["pos_emb"][pos_ids][None, :, :]
           + packed["type_emb"][token_type_ids]).reshape(B * S, H)

    # additive attention mask (BERT convention), broadcast per-head inside the kernel
    mask_add = (1.0 - attention_mask.astype(jnp.float32)) * -10000.0        # (B, S)

    args = (emb, mask_add,
            packed["emb_ln_g"], packed["emb_ln_b"],
            packed["wqkv"], packed["bqkv"], packed["wo"], packed["bo"],
            packed["ln1_g"], packed["ln1_b"],
            packed["wi"], packed["bi"], packed["wp"], packed["bp"],
            packed["ln2_g"], packed["ln2_b"],
            packed["pool_w"], packed["pool_b"], packed["cls_w"], packed["cls_b"])

    vmem = pl.BlockSpec(memory_space=pltpu.MemorySpace.VMEM)
    kernel = functools.partial(_bert_forward_kernel, B=B, S=S, H=H, nH=nH, L=L,
                               eps=cfg.layer_norm_eps)
    # No grid: total weights + activations << default scoped VMEM at this toy size.
    # (Classifier output stays (B, 3): a single masked store, not worth padding to 128.)
    logits = pl.pallas_call(
        kernel,
        out_shape=jax.ShapeDtypeStruct((B, 3), jnp.float32),
        in_specs=[vmem] * len(args),
        out_specs=vmem,
    )(*args)
    return logits


if __name__ == "__main__":
    cfg = Config()
    key = jax.random.PRNGKey(0)
    pkey, ikey = jax.random.split(key)

    params = init_params(cfg, pkey)
    packed = pack_params(params, cfg)

    B, S = 2, 8
    input_ids = jax.random.randint(ikey, (B, S), 0, cfg.vocab_size, dtype=jnp.int32)
    token_type_ids = jnp.zeros((B, S), dtype=jnp.int32)
    attention_mask = jnp.ones((B, S), dtype=jnp.int32).at[1, 6:].set(0)  # pad batch 1

    fwd = jax.jit(lambda pk, ids, am, tt: sentiment_model_forward(pk, cfg, ids, am, tt))
    logits = jax.block_until_ready(fwd(packed, input_ids, attention_mask, token_type_ids))
    assert logits.shape == (B, 3) and logits.dtype == jnp.float32
    print("KERNEL_OK")
</pallas_src>

<mosaic_0001>
module attributes {stable_mosaic.version = 11 : i64} {
  func.func @_bert_forward_kernel(%arg0: memref<16x32xf32, #tpu.memory_space<vmem>>, %arg1: memref<2x8xf32, #tpu.memory_space<vmem>>, %arg2: memref<1x32xf32, #tpu.memory_space<vmem>>, %arg3: memref<1x32xf32, #tpu.memory_space<vmem>>, %arg4: memref<2x32x96xbf16, #tpu.memory_space<vmem>>, %arg5: memref<2x1x96xf32, #tpu.memory_space<vmem>>, %arg6: memref<2x32x32xbf16, #tpu.memory_space<vmem>>, %arg7: memref<2x1x32xf32, #tpu.memory_space<vmem>>, %arg8: memref<2x1x32xf32, #tpu.memory_space<vmem>>, %arg9: memref<2x1x32xf32, #tpu.memory_space<vmem>>, %arg10: memref<2x32x64xbf16, #tpu.memory_space<vmem>>, %arg11: memref<2x1x64xf32, #tpu.memory_space<vmem>>, %arg12: memref<2x64x32xbf16, #tpu.memory_space<vmem>>, %arg13: memref<2x1x32xf32, #tpu.memory_space<vmem>>, %arg14: memref<2x1x32xf32, #tpu.memory_space<vmem>>, %arg15: memref<2x1x32xf32, #tpu.memory_space<vmem>>, %arg16: memref<32x32xbf16, #tpu.memory_space<vmem>>, %arg17: memref<1x32xf32, #tpu.memory_space<vmem>>, %arg18: memref<32x3xbf16, #tpu.memory_space<vmem>>, %arg19: memref<1x3xf32, #tpu.memory_space<vmem>>, %arg20: memref<2x3xf32, #tpu.memory_space<vmem>>) attributes {dimension_semantics = [], scalar_prefetch = 0 : i64, scratch_operands = 0 : i64, tpu.core_type = #tpu.core_type<tc>} {
    %c0 = arith.constant 0 : index
    %c0_0 = arith.constant 0 : index
    %0 = vector.load %arg1[%c0, %c0_0] : memref<2x8xf32, #tpu.memory_space<vmem>>, vector<2x8xf32>
    %1 = tpu.concatenate %0, %0 in 0 : vector<2x8xf32>, vector<2x8xf32> -> vector<4x8xf32>
    %2 = vector.shape_cast %1 : vector<4x8xf32> to vector<4x1x8xf32>
    %c0_1 = arith.constant 0 : index
    %c0_2 = arith.constant 0 : index
    %3 = vector.load %arg0[%c0_1, %c0_2] : memref<16x32xf32, #tpu.memory_space<vmem>>, vector<16x32xf32>
    %c0_3 = arith.constant 0 : index
    %c0_4 = arith.constant 0 : index
    %4 = vector.load %arg2[%c0_3, %c0_4] : memref<1x32xf32, #tpu.memory_space<vmem>>, vector<1x32xf32>
    %c0_5 = arith.constant 0 : index
    %c0_6 = arith.constant 0 : index
    %5 = vector.load %arg3[%c0_5, %c0_6] : memref<1x32xf32, #tpu.memory_space<vmem>>, vector<1x32xf32>
    %cst = arith.constant dense<0.000000e+00> : vector<16xf32>
    %6 = vector.multi_reduction <add>, %3, %cst [1] : vector<16x32xf32> to vector<16xf32>
    %7 = vector.shape_cast %6 : vector<16xf32> to vector<16x1xf32>
    %cst_7 = arith.constant 3.200000e+01 : f32
    %8 = vector.broadcast %cst_7 : f32 to vector<16x1xf32>
    %9 = arith.divf %7, %8 : vector<16x1xf32>
    %10 = vector.broadcast %9 : vector<16x1xf32> to vector<16x32xf32>
    %11 = arith.subf %3, %10 : vector<16x32xf32>
    %12 = arith.mulf %11, %11 : vector<16x32xf32>
    %cst_8 = arith.constant dense<0.000000e+00> : vector<16xf32>
    %13 = vector.multi_reduction <add>, %12, %cst_8 [1] : vector<16x32xf32> to vector<16xf32>
    %14 = vector.shape_cast %13 : vector<16xf32> to vector<16x1xf32>
    %cst_9 = arith.constant 3.200000e+01 : f32
    %15 = vector.broadcast %cst_9 : f32 to vector<16x1xf32>
    %16 = arith.divf %14, %15 : vector<16x1xf32>
    %cst_10 = arith.constant 9.99999996E-13 : f32
    %17 = vector.broadcast %cst_10 : f32 to vector<16x1xf32>
    %18 = arith.addf %16, %17 : vector<16x1xf32>
    %19 = math.rsqrt %18 : vector<16x1xf32>
    %20 = vector.broadcast %19 : vector<16x1xf32> to vector<16x32xf32>
    %21 = arith.mulf %11, %20 : vector<16x32xf32>
    %22 = vector.broadcast %4 : vector<1x32xf32> to vector<16x32xf32>
    %23 = arith.mulf %21, %22 : vector<16x32xf32>
    %24 = vector.broadcast %5 : vector<1x32xf32> to vector<16x32xf32>
    %25 = arith.addf %23, %24 : vector<16x32xf32>
    %c0_11 = arith.constant 0 : index
    %c0_12 = arith.constant 0 : index
    %c0_13 = arith.constant 0 : index
    %26 = vector.load %arg4[%c0_11, %c0_12, %c0_13] : memref<2x32x96xbf16, #tpu.memory_space<vmem>>, vector<1x32x96xbf16>
    %27 = vector.shape_cast %26 : vector<1x32x96xbf16> to vector<32x96xbf16>
    %28 = arith.truncf %25 : vector<16x32xf32> to vector<16x32xbf16>
    %cst_14 = arith.constant dense<0.000000e+00> : vector<16x96xf32>
    %29 = tpu.matmul %28, %27, %cst_14 {dimension_numbers = #tpu.dot_dimension_numbers<[1], [0], [0], [1], [0, 0, 1, 1], [], []>} : vector<16x32xbf16>, vector<32x96xbf16>, vector<16x96xf32> -> vector<16x96xf32>
    %c0_15 = arith.constant 0 : index
    %c0_16 = arith.constant 0 : index
    %c0_17 = arith.constant 0 : index
    %30 = vector.load %arg5[%c0_15, %c0_16, %c0_17] : memref<2x1x96xf32, #tpu.memory_space<vmem>>, vector<1x1x96xf32>
    %31 = vector.shape_cast %30 : vector<1x1x96xf32> to vector<1x96xf32>
    %32 = vector.broadcast %31 : vector<1x96xf32> to vector<16x96xf32>
    %33 = arith.addf %29, %32 : vector<16x96xf32>
    %34 = arith.truncf %33 : vector<16x96xf32> to vector<16x96xbf16>
    %35 = vector.extract_strided_slice %34 {offsets = [0, 0], sizes = [16, 16], strides = [1, 1]} : vector<16x96xbf16> to vector<16x16xbf16>
    %36 = vector.shape_cast %35 : vector<16x16xbf16> to vector<2x8x16xbf16>
    %37 = vector.extract_strided_slice %34 {offsets = [0, 16], sizes = [16, 16], strides = [1, 1]} : vector<16x96xbf16> to vector<16x16xbf16>
    %38 = vector.shape_cast %37 : vector<16x16xbf16> to vector<2x8x16xbf16>
    %39 = tpu.concatenate %36, %38 in 0 : vector<2x8x16xbf16>, vector<2x8x16xbf16> -> vector<4x8x16xbf16>
    %40 = vector.extract_strided_slice %34 {offsets = [0, 32], sizes = [16, 16], strides = [1, 1]} : vector<16x96xbf16> to vector<16x16xbf16>
    %41 = vector.shape_cast %40 : vector<16x16xbf16> to vector<2x8x16xbf16>
    %42 = vector.extract_strided_slice %34 {offsets = [0, 48], sizes = [16, 16], strides = [1, 1]} : vector<16x96xbf16> to vector<16x16xbf16>
    %43 = vector.shape_cast %42 : vector<16x16xbf16> to vector<2x8x16xbf16>
    %44 = tpu.concatenate %41, %43 in 0 : vector<2x8x16xbf16>, vector<2x8x16xbf16> -> vector<4x8x16xbf16>
    %45 = vector.extract_strided_slice %34 {offsets = [0, 64], sizes = [16, 16], strides = [1, 1]} : vector<16x96xbf16> to vector<16x16xbf16>
    %46 = vector.shape_cast %45 : vector<16x16xbf16> to vector<2x8x16xbf16>
    %47 = vector.extract_strided_slice %34 {offsets = [0, 80], sizes = [16, 16], strides = [1, 1]} : vector<16x96xbf16> to vector<16x16xbf16>
    %48 = vector.shape_cast %47 : vector<16x16xbf16> to vector<2x8x16xbf16>
    %49 = tpu.concatenate %46, %48 in 0 : vector<2x8x16xbf16>, vector<2x8x16xbf16> -> vector<4x8x16xbf16>
    "tpu.trace_start"() <{level = 10 : i32, message = "bqd,bkd->bqk"}> : () -> ()
    %cst_18 = arith.constant dense<0.000000e+00> : vector<4x8x8xf32>
    %50 = tpu.matmul %39, %44, %cst_18 {dimension_numbers = #tpu.dot_dimension_numbers<[2], [2], [1], [1], [0, 0, 0, 1, 1, 1], [0], [0]>} : vector<4x8x16xbf16>, vector<4x8x16xbf16>, vector<4x8x8xf32> -> vector<4x8x8xf32>
    "tpu.trace_stop"() : () -> ()
    %cst_19 = arith.constant 2.500000e-01 : f32
    %51 = vector.broadcast %cst_19 : f32 to vector<4x8x8xf32>
    %52 = arith.mulf %50, %51 : vector<4x8x8xf32>
    %53 = vector.broadcast %2 : vector<4x1x8xf32> to vector<4x8x8xf32>
    %54 = arith.addf %52, %53 : vector<4x8x8xf32>
    %cst_20 = arith.constant dense<0xFF800000> : vector<4x8xf32>
    %55 = vector.multi_reduction <maximumf>, %54, %cst_20 [2] : vector<4x8x8xf32> to vector<4x8xf32>
    %56 = vector.shape_cast %55 : vector<4x8xf32> to vector<4x8x1xf32>
    %57 = vector.broadcast %56 : vector<4x8x1xf32> to vector<4x8x8xf32>
    %58 = arith.subf %54, %57 : vector<4x8x8xf32>
    %59 = math.exp %58 : vector<4x8x8xf32>
    %cst_21 = arith.constant dense<0.000000e+00> : vector<4x8xf32>
    %60 = vector.multi_reduction <add>, %59, %cst_21 [2] : vector<4x8x8xf32> to vector<4x8xf32>
    %61 = vector.shape_cast %60 : vector<4x8xf32> to vector<4x8x1xf32>
    %62 = tpu.reciprocal %61 {approx = true} : vector<4x8x1xf32> -> vector<4x8x1xf32>
    %63 = vector.broadcast %62 : vector<4x8x1xf32> to vector<4x8x8xf32>
    %64 = arith.mulf %59, %63 : vector<4x8x8xf32>
    %65 = arith.truncf %64 : vector<4x8x8xf32> to vector<4x8x8xbf16>
    "tpu.trace_start"() <{level = 10 : i32, message = "bqk,bkd->bqd"}> : () -> ()
    %cst_22 = arith.constant dense<0.000000e+00> : vector<4x8x16xf32>
    %66 = tpu.matmul %65, %49, %cst_22 {dimension_numbers = #tpu.dot_dimension_numbers<[2], [1], [1], [2], [0, 0, 0, 1, 1, 2], [0], [0]>} : vector<4x8x8xbf16>, vector<4x8x16xbf16>, vector<4x8x16xf32> -> vector<4x8x16xf32>
    "tpu.trace_stop"() : () -> ()
    %67 = vector.extract_strided_slice %66 {offsets = [0, 0, 0], sizes = [2, 8, 16], strides = [1, 1, 1]} : vector<4x8x16xf32> to vector<2x8x16xf32>
    %68 = vector.shape_cast %67 : vector<2x8x16xf32> to vector<16x16xf32>
    %69 = vector.extract_strided_slice %66 {offsets = [2, 0, 0], sizes = [2, 8, 16], strides = [1, 1, 1]} : vector<4x8x16xf32> to vector<2x8x16xf32>
    %70 = vector.shape_cast %69 : vector<2x8x16xf32> to vector<16x16xf32>
    %71 = tpu.concatenate %68, %70 in 1 : vector<16x16xf32>, vector<16x16xf32> -> vector<16x32xf32>
    %c0_23 = arith.constant 0 : index
    %c0_24 = arith.constant 0 : index
    %c0_25 = arith.constant 0 : index
    %72 = vector.load %arg6[%c0_23, %c0_24, %c0_25] : memref<2x32x32xbf16, #tpu.memory_space<vmem>>, vector<1x32x32xbf16>
    %73 = vector.shape_cast %72 : vector<1x32x32xbf16> to vector<32x32xbf16>
    %74 = arith.truncf %71 : vector<16x32xf32> to vector<16x32xbf16>
    %cst_26 = arith.constant dense<0.000000e+00> : vector<16x32xf32>
    %75 = tpu.matmul %74, %73, %cst_26 {dimension_numbers = #tpu.dot_dimension_numbers<[1], [0], [0], [1], [0, 0, 1, 1], [], []>} : vector<16x32xbf16>, vector<32x32xbf16>, vector<16x32xf32> -> vector<16x32xf32>
    %c0_27 = arith.constant 0 : index
    %c0_28 = arith.constant 0 : index
    %c0_29 = arith.constant 0 : index
    %76 = vector.load %arg7[%c0_27, %c0_28, %c0_29] : memref<2x1x32xf32, #tpu.memory_space<vmem>>, vector<1x1x32xf32>
    %77 = vector.shape_cast %76 : vector<1x1x32xf32> to vector<1x32xf32>
    %78 = vector.broadcast %77 : vector<1x32xf32> to vector<16x32xf32>
    %79 = arith.addf %75, %78 : vector<16x32xf32>
    %80 = arith.addf %79, %25 : vector<16x32xf32>
    %c0_30 = arith.constant 0 : index
    %c0_31 = arith.constant 0 : index
    %c0_32 = arith.constant 0 : index
    %81 = vector.load %arg8[%c0_30, %c0_31, %c0_32] : memref<2x1x32xf32, #tpu.memory_space<vmem>>, vector<1x1x32xf32>
    %82 = vector.shape_cast %81 : vector<1x1x32xf32> to vector<1x32xf32>
    %c0_33 = arith.constant 0 : index
    %c0_34 = arith.constant 0 : index
    %c0_35 = arith.constant 0 : index
    %83 = vector.load %arg9[%c0_33, %c0_34, %c0_35] : memref<2x1x32xf32, #tpu.memory_space<vmem>>, vector<1x1x32xf32>
    %84 = vector.shape_cast %83 : vector<1x1x32xf32> to vector<1x32xf32>
    %cst_36 = arith.constant dense<0.000000e+00> : vector<16xf32>
    %85 = vector.multi_reduction <add>, %80, %cst_36 [1] : vector<16x32xf32> to vector<16xf32>
    %86 = vector.shape_cast %85 : vector<16xf32> to vector<16x1xf32>
    %cst_37 = arith.constant 3.200000e+01 : f32
    %87 = vector.broadcast %cst_37 : f32 to vector<16x1xf32>
    %88 = arith.divf %86, %87 : vector<16x1xf32>
    %89 = vector.broadcast %88 : vector<16x1xf32> to vector<16x32xf32>
    %90 = arith.subf %80, %89 : vector<16x32xf32>
    %91 = arith.mulf %90, %90 : vector<16x32xf32>
    %cst_38 = arith.constant dense<0.000000e+00> : vector<16xf32>
    %92 = vector.multi_reduction <add>, %91, %cst_38 [1] : vector<16x32xf32> to vector<16xf32>
    %93 = vector.shape_cast %92 : vector<16xf32> to vector<16x1xf32>
    %cst_39 = arith.constant 3.200000e+01 : f32
    %94 = vector.broadcast %cst_39 : f32 to vector<16x1xf32>
    %95 = arith.divf %93, %94 : vector<16x1xf32>
    %cst_40 = arith.constant 9.99999996E-13 : f32
    %96 = vector.broadcast %cst_40 : f32 to vector<16x1xf32>
    %97 = arith.addf %95, %96 : vector<16x1xf32>
    %98 = math.rsqrt %97 : vector<16x1xf32>
    %99 = vector.broadcast %98 : vector<16x1xf32> to vector<16x32xf32>
    %100 = arith.mulf %90, %99 : vector<16x32xf32>
    %101 = vector.broadcast %82 : vector<1x32xf32> to vector<16x32xf32>
    %102 = arith.mulf %100, %101 : vector<16x32xf32>
    %103 = vector.broadcast %84 : vector<1x32xf32> to vector<16x32xf32>
    %104 = arith.addf %102, %103 : vector<16x32xf32>
    %c0_41 = arith.constant 0 : index
    %c0_42 = arith.constant 0 : index
    %c0_43 = arith.constant 0 : index
    %105 = vector.load %arg10[%c0_41, %c0_42, %c0_43] : memref<2x32x64xbf16, #tpu.memory_space<vmem>>, vector<1x32x64xbf16>
    %106 = vector.shape_cast %105 : vector<1x32x64xbf16> to vector<32x64xbf16>
    %107 = arith.truncf %104 : vector<16x32xf32> to vector<16x32xbf16>
    %cst_44 = arith.constant dense<0.000000e+00> : vector<16x64xf32>
    %108 = tpu.matmul %107, %106, %cst_44 {dimension_numbers = #tpu.dot_dimension_numbers<[1], [0], [0], [1], [0, 0, 1, 1], [], []>} : vector<16x32xbf16>, vector<32x64xbf16>, vector<16x64xf32> -> vector<16x64xf32>
    %c0_45 = arith.constant 0 : index
    %c0_46 = arith.constant 0 : index
    %c0_47 = arith.constant 0 : index
    %109 = vector.load %arg11[%c0_45, %c0_46, %c0_47] : memref<2x1x64xf32, #tpu.memory_space<vmem>>, vector<1x1x64xf32>
    %110 = vector.shape_cast %109 : vector<1x1x64xf32> to vector<1x64xf32>
    %111 = vector.broadcast %110 : vector<1x64xf32> to vector<16x64xf32>
    %112 = arith.addf %108, %111 : vector<16x64xf32>
    %cst_48 = arith.constant 5.000000e-01 : f32
    %113 = vector.broadcast %cst_48 : f32 to vector<16x64xf32>
    %114 = arith.mulf %113, %112 : vector<16x64xf32>
    %cst_49 = arith.constant 0.707106769 : f32
    %115 = vector.broadcast %cst_49 : f32 to vector<16x64xf32>
    %116 = arith.mulf %112, %115 : vector<16x64xf32>
    %cst_50 = arith.constant 0.000000e+00 : f32
    %117 = vector.broadcast %cst_50 : f32 to vector<16x64xf32>
    %118 = arith.cmpf olt, %116, %117 : vector<16x64xf32>
    %cst_51 = arith.constant -1.000000e+00 : f32
    %cst_52 = arith.constant 1.000000e+00 : f32
    %119 = vector.broadcast %cst_51 : f32 to vector<16x64xf32>
    %120 = vector.broadcast %cst_52 : f32 to vector<16x64xf32>
    %121 = arith.select %118, %119, %120 : vector<16x64xi1>, vector<16x64xf32>
    %122 = math.absf %116 : vector<16x64xf32>
    %cst_53 = arith.constant 0.327591091 : f32
    %123 = vector.broadcast %cst_53 : f32 to vector<16x64xf32>
    %124 = arith.mulf %123, %122 : vector<16x64xf32>
    %cst_54 = arith.constant 1.000000e+00 : f32
    %125 = vector.broadcast %cst_54 : f32 to vector<16x64xf32>
    %126 = arith.addf %125, %124 : vector<16x64xf32>
    %cst_55 = arith.constant 1.000000e+00 : f32
    %127 = vector.broadcast %cst_55 : f32 to vector<16x64xf32>
    %128 = arith.divf %127, %126 : vector<16x64xf32>
    %cst_56 = arith.constant 1.06140542 : f32
    %129 = vector.broadcast %cst_56 : f32 to vector<16x64xf32>
    %130 = arith.mulf %129, %128 : vector<16x64xf32>
    %cst_57 = arith.constant -1.45315206 : f32
    %131 = vector.broadcast %cst_57 : f32 to vector<16x64xf32>
    %132 = arith.addf %130, %131 : vector<16x64xf32>
    %133 = arith.mulf %132, %128 : vector<16x64xf32>
    %cst_58 = arith.constant 1.42141378 : f32
    %134 = vector.broadcast %cst_58 : f32 to vector<16x64xf32>
    %135 = arith.addf %133, %134 : vector<16x64xf32>
    %136 = arith.mulf %135, %128 : vector<16x64xf32>
    %cst_59 = arith.constant -0.284496725 : f32
    %137 = vector.broadcast %cst_59 : f32 to vector<16x64xf32>
    %138 = arith.addf %136, %137 : vector<16x64xf32>
    %139 = arith.mulf %138, %128 : vector<16x64xf32>
    %cst_60 = arith.constant 0.254829586 : f32
    %140 = vector.broadcast %cst_60 : f32 to vector<16x64xf32>
    %141 = arith.addf %139, %140 : vector<16x64xf32>
    %142 = arith.mulf %141, %128 : vector<16x64xf32>
    %cst_61 = arith.constant 0.000000e+00 : f32
    %143 = vector.broadcast %cst_61 : f32 to vector<16x64xf32>
    %144 = arith.subf %143, %122 : vector<16x64xf32>
    %145 = arith.mulf %144, %122 : vector<16x64xf32>
    %146 = math.exp %145 : vector<16x64xf32>
    %147 = arith.mulf %142, %146 : vector<16x64xf32>
    %cst_62 = arith.constant 1.000000e+00 : f32
    %148 = vector.broadcast %cst_62 : f32 to vector<16x64xf32>
    %149 = arith.subf %148, %147 : vector<16x64xf32>
    %150 = arith.mulf %121, %149 : vector<16x64xf32>
    %cst_63 = arith.constant 1.000000e+00 : f32
    %151 = vector.broadcast %cst_63 : f32 to vector<16x64xf32>
    %152 = arith.addf %151, %150 : vector<16x64xf32>
    %153 = arith.mulf %114, %152 : vector<16x64xf32>
    %c0_64 = arith.constant 0 : index
    %c0_65 = arith.constant 0 : index
    %c0_66 = arith.constant 0 : index
    %154 = vector.load %arg12[%c0_64, %c0_65, %c0_66] : memref<2x64x32xbf16, #tpu.memory_space<vmem>>, vector<1x64x32xbf16>
    %155 = vector.shape_cast %154 : vector<1x64x32xbf16> to vector<64x32xbf16>
    %156 = arith.truncf %153 : vector<16x64xf32> to vector<16x64xbf16>
    %cst_67 = arith.constant dense<0.000000e+00> : vector<16x32xf32>
    %157 = tpu.matmul %156, %155, %cst_67 {dimension_numbers = #tpu.dot_dimension_numbers<[1], [0], [0], [1], [0, 0, 1, 1], [], []>} : vector<16x64xbf16>, vector<64x32xbf16>, vector<16x32xf32> -> vector<16x32xf32>
    %c0_68 = arith.constant 0 : index
    %c0_69 = arith.constant 0 : index
    %c0_70 = arith.constant 0 : index
    %158 = vector.load %arg13[%c0_68, %c0_69, %c0_70] : memref<2x1x32xf32, #tpu.memory_space<vmem>>, vector<1x1x32xf32>
    %159 = vector.shape_cast %158 : vector<1x1x32xf32> to vector<1x32xf32>
    %160 = vector.broadcast %159 : vector<1x32xf32> to vector<16x32xf32>
    %161 = arith.addf %157, %160 : vector<16x32xf32>
    %162 = arith.addf %161, %104 : vector<16x32xf32>
    %c0_71 = arith.constant 0 : index
    %c0_72 = arith.constant 0 : index
    %c0_73 = arith.constant 0 : index
    %163 = vector.load %arg14[%c0_71, %c0_72, %c0_73] : memref<2x1x32xf32, #tpu.memory_space<vmem>>, vector<1x1x32xf32>
    %164 = vector.shape_cast %163 : vector<1x1x32xf32> to vector<1x32xf32>
    %c0_74 = arith.constant 0 : index
    %c0_75 = arith.constant 0 : index
    %c0_76 = arith.constant 0 : index
    %165 = vector.load %arg15[%c0_74, %c0_75, %c0_76] : memref<2x1x32xf32, #tpu.memory_space<vmem>>, vector<1x1x32xf32>
    %166 = vector.shape_cast %165 : vector<1x1x32xf32> to vector<1x32xf32>
    %cst_77 = arith.constant dense<0.000000e+00> : vector<16xf32>
    %167 = vector.multi_reduction <add>, %162, %cst_77 [1] : vector<16x32xf32> to vector<16xf32>
    %168 = vector.shape_cast %167 : vector<16xf32> to vector<16x1xf32>
    %cst_78 = arith.constant 3.200000e+01 : f32
    %169 = vector.broadcast %cst_78 : f32 to vector<16x1xf32>
    %170 = arith.divf %168, %169 : vector<16x1xf32>
    %171 = vector.broadcast %170 : vector<16x1xf32> to vector<16x32xf32>
    %172 = arith.subf %162, %171 : vector<16x32xf32>
    %173 = arith.mulf %172, %172 : vector<16x32xf32>
    %cst_79 = arith.constant dense<0.000000e+00> : vector<16xf32>
    %174 = vector.multi_reduction <add>, %173, %cst_79 [1] : vector<16x32xf32> to vector<16xf32>
    %175 = vector.shape_cast %174 : vector<16xf32> to vector<16x1xf32>
    %cst_80 = arith.constant 3.200000e+01 : f32
    %176 = vector.broadcast %cst_80 : f32 to vector<16x1xf32>
    %177 = arith.divf %175, %176 : vector<16x1xf32>
    %cst_81 = arith.constant 9.99999996E-13 : f32
    %178 = vector.broadcast %cst_81 : f32 to vector<16x1xf32>
    %179 = arith.addf %177, %178 : vector<16x1xf32>
    %180 = math.rsqrt %179 : vector<16x1xf32>
    %181 = vector.broadcast %180 : vector<16x1xf32> to vector<16x32xf32>
    %182 = arith.mulf %172, %181 : vector<16x32xf32>
    %183 = vector.broadcast %164 : vector<1x32xf32> to vector<16x32xf32>
    %184 = arith.mulf %182, %183 : vector<16x32xf32>
    %185 = vector.broadcast %166 : vector<1x32xf32> to vector<16x32xf32>
    %186 = arith.addf %184, %185 : vector<16x32xf32>
    %c1 = arith.constant 1 : index
    %c0_82 = arith.constant 0 : index
    %c0_83 = arith.constant 0 : index
    %187 = vector.load %arg4[%c1, %c0_82, %c0_83] : memref<2x32x96xbf16, #tpu.memory_space<vmem>>, vector<1x32x96xbf16>
    %188 = vector.shape_cast %187 : vector<1x32x96xbf16> to vector<32x96xbf16>
    %189 = arith.truncf %186 : vector<16x32xf32> to vector<16x32xbf16>
    %cst_84 = arith.constant dense<0.000000e+00> : vector<16x96xf32>
    %190 = tpu.matmul %189, %188, %cst_84 {dimension_numbers = #tpu.dot_dimension_numbers<[1], [0], [0], [1], [0, 0, 1, 1], [], []>} : vector<16x32xbf16>, vector<32x96xbf16>, vector<16x96xf32> -> vector<16x96xf32>
    %c1_85 = arith.constant 1 : index
    %c0_86 = arith.constant 0 : index
    %c0_87 = arith.constant 0 : index
    %191 = vector.load %arg5[%c1_85, %c0_86, %c0_87] : memref<2x1x96xf32, #tpu.memory_space<vmem>>, vector<1x1x96xf32>
    %192 = vector.shape_cast %191 : vector<1x1x96xf32> to vector<1x96xf32>
    %193 = vector.broadcast %192 : vector<1x96xf32> to vector<16x96xf32>
    %194 = arith.addf %190, %193 : vector<16x96xf32>
    %195 = arith.truncf %194 : vector<16x96xf32> to vector<16x96xbf16>
    %196 = vector.extract_strided_slice %195 {offsets = [0, 0], sizes = [16, 16], strides = [1, 1]} : vector<16x96xbf16> to vector<16x16xbf16>
    %197 = vector.shape_cast %196 : vector<16x16xbf16> to vector<2x8x16xbf16>
    %198 = vector.extract_strided_slice %195 {offsets = [0, 16], sizes = [16, 16], strides = [1, 1]} : vector<16x96xbf16> to vector<16x16xbf16>
    %199 = vector.shape_cast %198 : vector<16x16xbf16> to vector<2x8x16xbf16>
    %200 = tpu.concatenate %197, %199 in 0 : vector<2x8x16xbf16>, vector<2x8x16xbf16> -> vector<4x8x16xbf16>
    %201 = vector.extract_strided_slice %195 {offsets = [0, 32], sizes = [16, 16], strides = [1, 1]} : vector<16x96xbf16> to vector<16x16xbf16>
    %202 = vector.shape_cast %201 : vector<16x16xbf16> to vector<2x8x16xbf16>
    %203 = vector.extract_strided_slice %195 {offsets = [0, 48], sizes = [16, 16], strides = [1, 1]} : vector<16x96xbf16> to vector<16x16xbf16>
    %204 = vector.shape_cast %203 : vector<16x16xbf16> to vector<2x8x16xbf16>
    %205 = tpu.concatenate %202, %204 in 0 : vector<2x8x16xbf16>, vector<2x8x16xbf16> -> vector<4x8x16xbf16>
    %206 = vector.extract_strided_slice %195 {offsets = [0, 64], sizes = [16, 16], strides = [1, 1]} : vector<16x96xbf16> to vector<16x16xbf16>
    %207 = vector.shape_cast %206 : vector<16x16xbf16> to vector<2x8x16xbf16>
    %208 = vector.extract_strided_slice %195 {offsets = [0, 80], sizes = [16, 16], strides = [1, 1]} : vector<16x96xbf16> to vector<16x16xbf16>
    %209 = vector.shape_cast %208 : vector<16x16xbf16> to vector<2x8x16xbf16>
    %210 = tpu.concatenate %207, %209 in 0 : vector<2x8x16xbf16>, vector<2x8x16xbf16> -> vector<4x8x16xbf16>
    "tpu.trace_start"() <{level = 10 : i32, message = "bqd,bkd->bqk"}> : () -> ()
    %cst_88 = arith.constant dense<0.000000e+00> : vector<4x8x8xf32>
    %211 = tpu.matmul %200, %205, %cst_88 {dimension_numbers = #tpu.dot_dimension_numbers<[2], [2], [1], [1], [0, 0, 0, 1, 1, 1], [0], [0]>} : vector<4x8x16xbf16>, vector<4x8x16xbf16>, vector<4x8x8xf32> -> vector<4x8x8xf32>
    "tpu.trace_stop"() : () -> ()
    %cst_89 = arith.constant 2.500000e-01 : f32
    %212 = vector.broadcast %cst_89 : f32 to vector<4x8x8xf32>
    %213 = arith.mulf %211, %212 : vector<4x8x8xf32>
    %214 = vector.broadcast %2 : vector<4x1x8xf32> to vector<4x8x8xf32>
    %215 = arith.addf %213, %214 : vector<4x8x8xf32>
    %cst_90 = arith.constant dense<0xFF800000> : vector<4x8xf32>
    %216 = vector.multi_reduction <maximumf>, %215, %cst_90 [2] : vector<4x8x8xf32> to vector<4x8xf32>
    %217 = vector.shape_cast %216 : vector<4x8xf32> to vector<4x8x1xf32>
    %218 = vector.broadcast %217 : vector<4x8x1xf32> to vector<4x8x8xf32>
    %219 = arith.subf %215, %218 : vector<4x8x8xf32>
    %220 = math.exp %219 : vector<4x8x8xf32>
    %cst_91 = arith.constant dense<0.000000e+00> : vector<4x8xf32>
    %221 = vector.multi_reduction <add>, %220, %cst_91 [2] : vector<4x8x8xf32> to vector<4x8xf32>
    %222 = vector.shape_cast %221 : vector<4x8xf32> to vector<4x8x1xf32>
    %223 = tpu.reciprocal %222 {approx = true} : vector<4x8x1xf32> -> vector<4x8x1xf32>
    %224 = vector.broadcast %223 : vector<4x8x1xf32> to vector<4x8x8xf32>
    %225 = arith.mulf %220, %224 : vector<4x8x8xf32>
    %226 = arith.truncf %225 : vector<4x8x8xf32> to vector<4x8x8xbf16>
    "tpu.trace_start"() <{level = 10 : i32, message = "bqk,bkd->bqd"}> : () -> ()
    %cst_92 = arith.constant dense<0.000000e+00> : vector<4x8x16xf32>
    %227 = tpu.matmul %226, %210, %cst_92 {dimension_numbers = #tpu.dot_dimension_numbers<[2], [1], [1], [2], [0, 0, 0, 1, 1, 2], [0], [0]>} : vector<4x8x8xbf16>, vector<4x8x16xbf16>, vector<4x8x16xf32> -> vector<4x8x16xf32>
    "tpu.trace_stop"() : () -> ()
    %228 = vector.extract_strided_slice %227 {offsets = [0, 0, 0], sizes = [2, 8, 16], strides = [1, 1, 1]} : vector<4x8x16xf32> to vector<2x8x16xf32>
    %229 = vector.shape_cast %228 : vector<2x8x16xf32> to vector<16x16xf32>
    %230 = vector.extract_strided_slice %227 {offsets = [2, 0, 0], sizes = [2, 8, 16], strides = [1, 1, 1]} : vector<4x8x16xf32> to vector<2x8x16xf32>
    %231 = vector.shape_cast %230 : vector<2x8x16xf32> to vector<16x16xf32>
    %232 = tpu.concatenate %229, %231 in 1 : vector<16x16xf32>, vector<16x16xf32> -> vector<16x32xf32>
    %c1_93 = arith.constant 1 : index
    %c0_94 = arith.constant 0 : index
    %c0_95 = arith.constant 0 : index
    %233 = vector.load %arg6[%c1_93, %c0_94, %c0_95] : memref<2x32x32xbf16, #tpu.memory_space<vmem>>, vector<1x32x32xbf16>
    %234 = vector.shape_cast %233 : vector<1x32x32xbf16> to vector<32x32xbf16>
    %235 = arith.truncf %232 : vector<16x32xf32> to vector<16x32xbf16>
    %cst_96 = arith.constant dense<0.000000e+00> : vector<16x32xf32>
    %236 = tpu.matmul %235, %234, %cst_96 {dimension_numbers = #tpu.dot_dimension_numbers<[1], [0], [0], [1], [0, 0, 1, 1], [], []>} : vector<16x32xbf16>, vector<32x32xbf16>, vector<16x32xf32> -> vector<16x32xf32>
    %c1_97 = arith.constant 1 : index
    %c0_98 = arith.constant 0 : index
    %c0_99 = arith.constant 0 : index
    %237 = vector.load %arg7[%c1_97, %c0_98, %c0_99] : memref<2x1x32xf32, #tpu.memory_space<vmem>>, vector<1x1x32xf32>
    %238 = vector.shape_cast %237 : vector<1x1x32xf32> to vector<1x32xf32>
    %239 = vector.broadcast %238 : vector<1x32xf32> to vector<16x32xf32>
    %240 = arith.addf %236, %239 : vector<16x32xf32>
    %241 = arith.addf %240, %186 : vector<16x32xf32>
    %c1_100 = arith.constant 1 : index
    %c0_101 = arith.constant 0 : index
    %c0_102 = arith.constant 0 : index
    %242 = vector.load %arg8[%c1_100, %c0_101, %c0_102] : memref<2x1x32xf32, #tpu.memory_space<vmem>>, vector<1x1x32xf32>
    %243 = vector.shape_cast %242 : vector<1x1x32xf32> to vector<1x32xf32>
    %c1_103 = arith.constant 1 : index
    %c0_104 = arith.constant 0 : index
    %c0_105 = arith.constant 0 : index
    %244 = vector.load %arg9[%c1_103, %c0_104, %c0_105] : memref<2x1x32xf32, #tpu.memory_space<vmem>>, vector<1x1x32xf32>
    %245 = vector.shape_cast %244 : vector<1x1x32xf32> to vector<1x32xf32>
    %cst_106 = arith.constant dense<0.000000e+00> : vector<16xf32>
    %246 = vector.multi_reduction <add>, %241, %cst_106 [1] : vector<16x32xf32> to vector<16xf32>
    %247 = vector.shape_cast %246 : vector<16xf32> to vector<16x1xf32>
    %cst_107 = arith.constant 3.200000e+01 : f32
    %248 = vector.broadcast %cst_107 : f32 to vector<16x1xf32>
    %249 = arith.divf %247, %248 : vector<16x1xf32>
    %250 = vector.broadcast %249 : vector<16x1xf32> to vector<16x32xf32>
    %251 = arith.subf %241, %250 : vector<16x32xf32>
    %252 = arith.mulf %251, %251 : vector<16x32xf32>
    %cst_108 = arith.constant dense<0.000000e+00> : vector<16xf32>
    %253 = vector.multi_reduction <add>, %252, %cst_108 [1] : vector<16x32xf32> to vector<16xf32>
    %254 = vector.shape_cast %253 : vector<16xf32> to vector<16x1xf32>
    %cst_109 = arith.constant 3.200000e+01 : f32
    %255 = vector.broadcast %cst_109 : f32 to vector<16x1xf32>
    %256 = arith.divf %254, %255 : vector<16x1xf32>
    %cst_110 = arith.constant 9.99999996E-13 : f32
    %257 = vector.broadcast %cst_110 : f32 to vector<16x1xf32>
    %258 = arith.addf %256, %257 : vector<16x1xf32>
    %259 = math.rsqrt %258 : vector<16x1xf32>
    %260 = vector.broadcast %259 : vector<16x1xf32> to vector<16x32xf32>
    %261 = arith.mulf %251, %260 : vector<16x32xf32>
    %262 = vector.broadcast %243 : vector<1x32xf32> to vector<16x32xf32>
    %263 = arith.mulf %261, %262 : vector<16x32xf32>
    %264 = vector.broadcast %245 : vector<1x32xf32> to vector<16x32xf32>
    %265 = arith.addf %263, %264 : vector<16x32xf32>
    %c1_111 = arith.constant 1 : index
    %c0_112 = arith.constant 0 : index
    %c0_113 = arith.constant 0 : index
    %266 = vector.load %arg10[%c1_111, %c0_112, %c0_113] : memref<2x32x64xbf16, #tpu.memory_space<vmem>>, vector<1x32x64xbf16>
    %267 = vector.shape_cast %266 : vector<1x32x64xbf16> to vector<32x64xbf16>
    %268 = arith.truncf %265 : vector<16x32xf32> to vector<16x32xbf16>
    %cst_114 = arith.constant dense<0.000000e+00> : vector<16x64xf32>
    %269 = tpu.matmul %268, %267, %cst_114 {dimension_numbers = #tpu.dot_dimension_numbers<[1], [0], [0], [1], [0, 0, 1, 1], [], []>} : vector<16x32xbf16>, vector<32x64xbf16>, vector<16x64xf32> -> vector<16x64xf32>
    %c1_115 = arith.constant 1 : index
    %c0_116 = arith.constant 0 : index
    %c0_117 = arith.constant 0 : index
    %270 = vector.load %arg11[%c1_115, %c0_116, %c0_117] : memref<2x1x64xf32, #tpu.memory_space<vmem>>, vector<1x1x64xf32>
    %271 = vector.shape_cast %270 : vector<1x1x64xf32> to vector<1x64xf32>
    %272 = vector.broadcast %271 : vector<1x64xf32> to vector<16x64xf32>
    %273 = arith.addf %269, %272 : vector<16x64xf32>
    %cst_118 = arith.constant 5.000000e-01 : f32
    %274 = vector.broadcast %cst_118 : f32 to vector<16x64xf32>
    %275 = arith.mulf %274, %273 : vector<16x64xf32>
    %cst_119 = arith.constant 0.707106769 : f32
    %276 = vector.broadcast %cst_119 : f32 to vector<16x64xf32>
    %277 = arith.mulf %273, %276 : vector<16x64xf32>
    %cst_120 = arith.constant 0.000000e+00 : f32
    %278 = vector.broadcast %cst_120 : f32 to vector<16x64xf32>
    %279 = arith.cmpf olt, %277, %278 : vector<16x64xf32>
    %cst_121 = arith.constant -1.000000e+00 : f32
    %cst_122 = arith.constant 1.000000e+00 : f32
    %280 = vector.broadcast %cst_121 : f32 to vector<16x64xf32>
    %281 = vector.broadcast %cst_122 : f32 to vector<16x64xf32>
    %282 = arith.select %279, %280, %281 : vector<16x64xi1>, vector<16x64xf32>
    %283 = math.absf %277 : vector<16x64xf32>
    %cst_123 = arith.constant 0.327591091 : f32
    %284 = vector.broadcast %cst_123 : f32 to vector<16x64xf32>
    %285 = arith.mulf %284, %283 : vector<16x64xf32>
    %cst_124 = arith.constant 1.000000e+00 : f32
    %286 = vector.broadcast %cst_124 : f32 to vector<16x64xf32>
    %287 = arith.addf %286, %285 : vector<16x64xf32>
    %cst_125 = arith.constant 1.000000e+00 : f32
    %288 = vector.broadcast %cst_125 : f32 to vector<16x64xf32>
    %289 = arith.divf %288, %287 : vector<16x64xf32>
    %cst_126 = arith.constant 1.06140542 : f32
    %290 = vector.broadcast %cst_126 : f32 to vector<16x64xf32>
    %291 = arith.mulf %290, %289 : vector<16x64xf32>
    %cst_127 = arith.constant -1.45315206 : f32
    %292 = vector.broadcast %cst_127 : f32 to vector<16x64xf32>
    %293 = arith.addf %291, %292 : vector<16x64xf32>
    %294 = arith.mulf %293, %289 : vector<16x64xf32>
    %cst_128 = arith.constant 1.42141378 : f32
    %295 = vector.broadcast %cst_128 : f32 to vector<16x64xf32>
    %296 = arith.addf %294, %295 : vector<16x64xf32>
    %297 = arith.mulf %296, %289 : vector<16x64xf32>
    %cst_129 = arith.constant -0.284496725 : f32
    %298 = vector.broadcast %cst_129 : f32 to vector<16x64xf32>
    %299 = arith.addf %297, %298 : vector<16x64xf32>
    %300 = arith.mulf %299, %289 : vector<16x64xf32>
    %cst_130 = arith.constant 0.254829586 : f32
    %301 = vector.broadcast %cst_130 : f32 to vector<16x64xf32>
    %302 = arith.addf %300, %301 : vector<16x64xf32>
    %303 = arith.mulf %302, %289 : vector<16x64xf32>
    %cst_131 = arith.constant 0.000000e+00 : f32
    %304 = vector.broadcast %cst_131 : f32 to vector<16x64xf32>
    %305 = arith.subf %304, %283 : vector<16x64xf32>
    %306 = arith.mulf %305, %283 : vector<16x64xf32>
    %307 = math.exp %306 : vector<16x64xf32>
    %308 = arith.mulf %303, %307 : vector<16x64xf32>
    %cst_132 = arith.constant 1.000000e+00 : f32
    %309 = vector.broadcast %cst_132 : f32 to vector<16x64xf32>
    %310 = arith.subf %309, %308 : vector<16x64xf32>
    %311 = arith.mulf %282, %310 : vector<16x64xf32>
    %cst_133 = arith.constant 1.000000e+00 : f32
    %312 = vector.broadcast %cst_133 : f32 to vector<16x64xf32>
    %313 = arith.addf %312, %311 : vector<16x64xf32>
    %314 = arith.mulf %275, %313 : vector<16x64xf32>
    %c1_134 = arith.constant 1 : index
    %c0_135 = arith.constant 0 : index
    %c0_136 = arith.constant 0 : index
    %315 = vector.load %arg12[%c1_134, %c0_135, %c0_136] : memref<2x64x32xbf16, #tpu.memory_space<vmem>>, vector<1x64x32xbf16>
    %316 = vector.shape_cast %315 : vector<1x64x32xbf16> to vector<64x32xbf16>
    %317 = arith.truncf %314 : vector<16x64xf32> to vector<16x64xbf16>
    %cst_137 = arith.constant dense<0.000000e+00> : vector<16x32xf32>
    %318 = tpu.matmul %317, %316, %cst_137 {dimension_numbers = #tpu.dot_dimension_numbers<[1], [0], [0], [1], [0, 0, 1, 1], [], []>} : vector<16x64xbf16>, vector<64x32xbf16>, vector<16x32xf32> -> vector<16x32xf32>
    %c1_138 = arith.constant 1 : index
    %c0_139 = arith.constant 0 : index
    %c0_140 = arith.constant 0 : index
    %319 = vector.load %arg13[%c1_138, %c0_139, %c0_140] : memref<2x1x32xf32, #tpu.memory_space<vmem>>, vector<1x1x32xf32>
    %320 = vector.shape_cast %319 : vector<1x1x32xf32> to vector<1x32xf32>
    %321 = vector.broadcast %320 : vector<1x32xf32> to vector<16x32xf32>
    %322 = arith.addf %318, %321 : vector<16x32xf32>
    %323 = arith.addf %322, %265 : vector<16x32xf32>
    %c1_141 = arith.constant 1 : index
    %c0_142 = arith.constant 0 : index
    %c0_143 = arith.constant 0 : index
    %324 = vector.load %arg14[%c1_141, %c0_142, %c0_143] : memref<2x1x32xf32, #tpu.memory_space<vmem>>, vector<1x1x32xf32>
    %325 = vector.shape_cast %324 : vector<1x1x32xf32> to vector<1x32xf32>
    %c1_144 = arith.constant 1 : index
    %c0_145 = arith.constant 0 : index
    %c0_146 = arith.constant 0 : index
    %326 = vector.load %arg15[%c1_144, %c0_145, %c0_146] : memref<2x1x32xf32, #tpu.memory_space<vmem>>, vector<1x1x32xf32>
    %327 = vector.shape_cast %326 : vector<1x1x32xf32> to vector<1x32xf32>
    %cst_147 = arith.constant dense<0.000000e+00> : vector<16xf32>
    %328 = vector.multi_reduction <add>, %323, %cst_147 [1] : vector<16x32xf32> to vector<16xf32>
    %329 = vector.shape_cast %328 : vector<16xf32> to vector<16x1xf32>
    %cst_148 = arith.constant 3.200000e+01 : f32
    %330 = vector.broadcast %cst_148 : f32 to vector<16x1xf32>
    %331 = arith.divf %329, %330 : vector<16x1xf32>
    %332 = vector.broadcast %331 : vector<16x1xf32> to vector<16x32xf32>
    %333 = arith.subf %323, %332 : vector<16x32xf32>
    %334 = arith.mulf %333, %333 : vector<16x32xf32>
    %cst_149 = arith.constant dense<0.000000e+00> : vector<16xf32>
    %335 = vector.multi_reduction <add>, %334, %cst_149 [1] : vector<16x32xf32> to vector<16xf32>
    %336 = vector.shape_cast %335 : vector<16xf32> to vector<16x1xf32>
    %cst_150 = arith.constant 3.200000e+01 : f32
    %337 = vector.broadcast %cst_150 : f32 to vector<16x1xf32>
    %338 = arith.divf %336, %337 : vector<16x1xf32>
    %cst_151 = arith.constant 9.99999996E-13 : f32
    %339 = vector.broadcast %cst_151 : f32 to vector<16x1xf32>
    %340 = arith.addf %338, %339 : vector<16x1xf32>
    %341 = math.rsqrt %340 : vector<16x1xf32>
    %342 = vector.broadcast %341 : vector<16x1xf32> to vector<16x32xf32>
    %343 = arith.mulf %333, %342 : vector<16x32xf32>
    %344 = vector.broadcast %325 : vector<1x32xf32> to vector<16x32xf32>
    %345 = arith.mulf %343, %344 : vector<16x32xf32>
    %346 = vector.broadcast %327 : vector<1x32xf32> to vector<16x32xf32>
    %347 = arith.addf %345, %346 : vector<16x32xf32>
    %348 = vector.shape_cast %347 : vector<16x32xf32> to vector<2x8x32xf32>
    %349 = vector.extract_strided_slice %348 {offsets = [0, 0, 0], sizes = [2, 1, 32], strides = [1, 1, 1]} : vector<2x8x32xf32> to vector<2x1x32xf32>
    %350 = vector.shape_cast %349 : vector<2x1x32xf32> to vector<2x32xf32>
    %c0_152 = arith.constant 0 : index
    %c0_153 = arith.constant 0 : index
    %351 = vector.load %arg16[%c0_152, %c0_153] : memref<32x32xbf16, #tpu.memory_space<vmem>>, vector<32x32xbf16>
    %352 = arith.truncf %350 : vector<2x32xf32> to vector<2x32xbf16>
    %cst_154 = arith.constant dense<0.000000e+00> : vector<2x32xf32>
    %353 = tpu.matmul %352, %351, %cst_154 {dimension_numbers = #tpu.dot_dimension_numbers<[1], [0], [0], [1], [0, 0, 1, 1], [], []>} : vector<2x32xbf16>, vector<32x32xbf16>, vector<2x32xf32> -> vector<2x32xf32>
    %c0_155 = arith.constant 0 : index
    %c0_156 = arith.constant 0 : index
    %354 = vector.load %arg17[%c0_155, %c0_156] : memref<1x32xf32, #tpu.memory_space<vmem>>, vector<1x32xf32>
    %355 = vector.broadcast %354 : vector<1x32xf32> to vector<2x32xf32>
    %356 = arith.addf %353, %355 : vector<2x32xf32>
    %357 = math.tanh %356 : vector<2x32xf32>
    %c0_157 = arith.constant 0 : index
    %c0_158 = arith.constant 0 : index
    %358 = vector.load %arg18[%c0_157, %c0_158] : memref<32x3xbf16, #tpu.memory_space<vmem>>, vector<32x3xbf16>
    %359 = arith.truncf %357 : vector<2x32xf32> to vector<2x32xbf16>
    %cst_159 = arith.constant dense<0.000000e+00> : vector<2x3xf32>
    %360 = tpu.matmul %359, %358, %cst_159 {dimension_numbers = #tpu.dot_dimension_numbers<[1], [0], [0], [1], [0, 0, 1, 1], [], []>} : vector<2x32xbf16>, vector<32x3xbf16>, vector<2x3xf32> -> vector<2x3xf32>
    %c0_160 = arith.constant 0 : index
    %c0_161 = arith.constant 0 : index
    %361 = vector.load %arg19[%c0_160, %c0_161] : memref<1x3xf32, #tpu.memory_space<vmem>>, vector<1x3xf32>
    %362 = vector.broadcast %361 : vector<1x3xf32> to vector<2x3xf32>
    %363 = arith.addf %360, %362 : vector<2x3xf32>
    %c0_162 = arith.constant 0 : index
    %c0_163 = arith.constant 0 : index
    %364 = vector.load %arg20[%c0_162, %c0_163] : memref<2x3xf32, #tpu.memory_space<vmem>>, vector<2x3xf32>
    tpu.vector_store %arg20[%c0_162, %c0_163], %363 {strides = array<i32>} : memref<2x3xf32, #tpu.memory_space<vmem>>, vector<2x3xf32>,
    return
  }
}

</mosaic_0001>

<bundles_post_ra>
// kernel: _lambda_.1
= control target key start
LH: loop header
LB: loop body
LE: loop exit
PB: predicated region body
PF: predicated region fallthrough
CT: control target
= control target key end

     0   :  { %s3173_s0 = inlined_call_operand.vmem [shape: f32[16,32], index: 0, kind: input, shape index: {}]   ;;  %s3174_s1 = inlined_call_operand.vmem [shape: f32[2,8], index: 1, kind: input, shape index: {}]   ;;  %s3175_s2 = inlined_call_operand.vmem [shape: f32[1,32], index: 2, kind: input, shape index: {}]   ;;  %s3176_s3 = inlined_call_operand.vmem [shape: f32[1,32], index: 3, kind: input, shape index: {}]   ;;  %s3177_s4 = inlined_call_operand.vmem [shape: bf16[2,32,96], index: 4, kind: input, shape index: {}]   ;;  %s3178_s5 = inlined_call_operand.vmem [shape: f32[2,1,96], index: 5, kind: input, shape index: {}]   ;;  %s3179_s6 = inlined_call_operand.vmem [shape: bf16[2,32,32], index: 6, kind: input, shape index: {}]   ;;  %s3180_s7 = inlined_call_operand.vmem [shape: f32[2,1,32], index: 7, kind: input, shape index: {}]   ;;  %s3181_s8 = inlined_call_operand.vmem [shape: f32[2,1,32], index: 8, kind: input, shape index: {}]   ;;  %s3182_s9 = inlined_call_operand.vmem [shape: f32[2,1,32], index: 9, kind: input, shape index: {}]   ;;  %s3183_s10 = inlined_call_operand.vmem [shape: bf16[2,32,64], index: 10, kind: input, shape index: {}]   ;;  %s3184_s11 = inlined_call_operand.vmem [shape: f32[2,1,64], index: 11, kind: input, shape index: {}]   ;;  %s3185_s12 = inlined_call_operand.vmem [shape: bf16[2,64,32], index: 12, kind: input, shape index: {}]   ;;  %s3186_s13 = inlined_call_operand.vmem [shape: f32[2,1,32], index: 13, kind: input, shape index: {}]   ;;  %s3187_s14 = inlined_call_operand.vmem [shape: f32[2,1,32], index: 14, kind: input, shape index: {}]   ;;  %s3188_s15 = inlined_call_operand.vmem [shape: f32[2,1,32], index: 15, kind: input, shape index: {}]   ;;  %s3189_s16 = inlined_call_operand.vmem [shape: bf16[32,32], index: 16, kind: input, shape index: {}]   ;;  %s3190_s17 = inlined_call_operand.vmem [shape: f32[1,32], index: 17, kind: input, shape index: {}]   ;;  %s3191_s18 = inlined_call_operand.vmem [shape: bf16[32,3], index: 18, kind: input, shape index: {}]   ;;  %s3192_s19 = inlined_call_operand.vmem [shape: f32[1,3], index: 19, kind: input, shape index: {}]   ;;  %s3193_s20 = inlined_call_operand.hbm [shape: f32[2,3], index: 20, kind: output, shape index: {}]  }
   0x1   :  { %3196 = sst [smem:[#allocation5_spill]] %s3173_s0 }
   0x2   :  { %3197 = sst [smem:[#allocation6_spill]] %s3174_s1 }
   0x3   :  { %3198 = sst [smem:[#allocation7_spill]] %s3175_s2 }
   0x4   :  { %3199 = sst [smem:[#allocation8_spill]] %s3176_s3 }
   0x5   :  { %3200 = sst [smem:[#allocation9_spill]] %s3177_s4 }
   0x6   :  { %s3201_s23 = sld [smem:[#allocation5_spill]]  ;;  %vm102_vm0 = vcmask 261120  }
   0xc   :  { %v98_v0 = vld [vmem:[%s3201_s23] sm:$0xff]  ;;  %v99_v1 = vld [vmem:[%s3201_s23 + $0x8] sm:$0xff] }
   0xd   :  { %v103_v2 = vsel %vm102_vm0, %v98_v0, 0.0  ;;  %v106_v3 = vsel %vm102_vm0, %v99_v1, 0.0 }
   0xe   :  { %104 = vadd.xlane.f32.xlu0 %v103_v2 }
  0x12   :  { %107 = vadd.xlane.f32.xlu0 %v106_v3 }
  0x13   :  { %25 = vsyncpa [#allocation3], 0  ;;  %s3202_s26 = sld [smem:[#allocation9_spill]]  ;;  %v2633_v15 = vmov 0.0   ;;  %vm2634_vm1 = vmmov 0   ;;  %s2635_s24 = smov 112   ;;  %v77_v57 = vlaneseq }
  0x14   :  { %2314 = vmatprep.subr.bf16.mxu0 %v2633_v15  ;;  %2318 = vmatprep.mubr.msk.bf16.mxu0 %vm2634_vm1, %v2633_v15  ;;  %s3203_s30 = sld [smem:[#allocation7_spill]]  ;;  %v2140_v34 = vld [vmem:[%s3178_s5] ss:$0 sm:$0xff]  ;;  %s2636_s2 = smov 96   ;;  %vm226_vm2 = vcmask 130048   ;;  %vm71_vm3 = vcmask 1041408  }
  0x15   :  { %2322 = vmatprep.subr.bf16.mxu1 %v2633_v15  ;;  %2324 = vmatprep.mubr.msk.bf16.mxu1 %vm2634_vm1, %v2633_v15  ;;  %s3204_s1 = sld [smem:[#allocation8_spill]]  ;;  %v2637_v55 = vmov 1966171168   ;;  %v78_v60 = vshrl.u32 %v77_v57, 7  ;;  %vm449_vm4 = vcmask 64512   ;;  %s2638_s28 = smov 64  }
  0x16   :  { %v75_v56 = vunpack.c.l.s4 %v2637_v55  ;;  %s3205_s27 = sld [smem:[#allocation6_spill]]  ;;  %vm503_vm5 = vcmask 1043456   ;;  %s2639_s21 = smov 16   ;;  %vm977_vm8 = vcmask 523264   ;;  %vm1996_vm11 = vcmask 1041409  }
  0x17   :  { %v427_v2 = vsub.s32 0, %v78_v60  ;;  %vm2122_vm12 = vcmask 17408  }
  0x18   :  { %v76_v59 = vunpack.c.0.s8 %v75_v56 }
  0x19   :  { %v2517_v14 = vld [vmem:[%s3202_s26 + $0x8] sm:$0xff]   ;;  %v2518_v16 = vld [vmem:[%s3202_s26] sm:$0xff]  }
  0x1a   :  { %2315 = vmatpush3.bf16.msra.mxu0 %v2517_v14  ;;  %v2138_v25 = vld [vmem:[%s3203_s30] ss:$0 sm:$0xff]  ;;  %v79_v62 = vsub.s32 %v76_v59, %v78_v60 }
  0x1b   :  { %2316 = vmatprep.subr.bf16.mxu0 %v2633_v15  ;;  %v2139_v29 = vld [vmem:[%s3204_s1] ss:$0 sm:$0xff] }
  0x1c   :  { %v67_v58 = vld [vmem:[%s3205_s27] sm:$0x3] }
  0x1d   :  { %v69_v61 = vrot.slane %v67_v58, 6 }
  0x1e   :  { %2317 = vmatpush3.bf16.msra.mxu0 %v2518_v16 }
  0x1f   :  { %2328 = vmatprep.subr.bf16.mxu0 %v2633_v15  ;;  %v72_v63 = vsel %vm71_vm3, %v67_v58, %v69_v61 }
  0x97   :  { %v105_v4 = vpop.xlane.xlu0 %104 }
  0x98   :  { %v110_v5 = vmul.f32 0.03125, %v105_v4 }
  0x9a   :  { %v112_v6 = vsub.f32 %v98_v0, %v110_v5  ;;  %v80_v0 = vrot.slane %v72_v63, %v79_v62 }
  0x9b   :  { %v108_v7 = vpop.xlane.xlu0 %107 }
  0x9c   :  { %v111_v8 = vmul.f32 0.03125, %v108_v7  ;;  %v114_v9 = vmul.f32 %v112_v6, %v112_v6  ;;  %v81_v3 = vcombine.high %v80_v0, %v80_v0 }
  0x9e   :  { %v113_v10 = vsub.f32 %v99_v1, %v111_v8  ;;  %v116_v11 = vsel %vm102_vm0, %v114_v9, 0.0  ;;  %v88_v1 = vrot.slane %v80_v0, %v79_v62  ;;  %v95_v5 = vrot.slane %v81_v3, %v79_v62 }
  0x9f   :  { %117 = vadd.xlane.f32.xlu1 %v116_v11 }
  0xa0   :  { %v115_v12 = vmul.f32 %v113_v10, %v113_v10  ;;  %v2834_v4 = vrot.slane %v88_v1, %v427_v2 }
  0xa2   :  { %v119_v13 = vsel %vm102_vm0, %v115_v12, 0.0 }
  0xa3   :  { %120 = vadd.xlane.f32.xlu1 %v119_v13 }
 0x128   :  { %v118_v17 = vpop.xlane.xlu1 %117 }
 0x129   :  { %v122_v18 = vmul.f32 0.03125, %v118_v17 }
 0x12b   :  { %v124_v19 = vadd.f32 1e-12, %v122_v18 }
 0x12c   :  { %v121_v20 = vpop.xlane.xlu1 %120 }
 0x12d   :  { %2541 = vrsqrt.f32 %v124_v19  ;;  %v123_v21 = vmul.f32 0.03125, %v121_v20 }
 0x12f   :  { %v125_v22 = vadd.f32 1e-12, %v123_v21 }
 0x131   :  { %2543 = vrsqrt.f32 %v125_v22  ;;  %v96_v22 = vcombine.high %v88_v1, %v88_v1 }
 0x13a   :  { %v2542_v23 = vpop.eup %2541 }
 0x13b   :  { %v128_v24 = vmul.f32 %v2542_v23, %v112_v6  ;;  %v2842_v23 = vrot.slane %v96_v22, %v427_v2 }
 0x13d   :  { %v136_v28 = vmul.f32 %v2138_v25, %v128_v24  ;;  %v97_v24 = vcombine.high %v95_v5, %v95_v5 }
 0x13e   :  { %v2544_v26 = vpop.eup %2543 }
 0x13f   :  { %v129_v27 = vmul.f32 %v2544_v26, %v113_v10  ;;  %v2777_v31 = vadd.f32 %v2139_v29, %v136_v28  ;;  %v2837_v10 = vrot.slane %v95_v5, %v427_v2 }
 0x141   :  { %v137_v30 = vmul.f32 %v2138_v25, %v129_v27 }
 0x143   :  { %v2779_v32 = vadd.f32 %v2139_v29, %v137_v30  ;;  %v2845_v29 = vrot.slane %v97_v24, %v427_v2 }
 0x145   :  { %v150_v33 = vpack.c.bf16 %v2779_v32, %v2777_v31 }
 0x147   :  { %2319 = vmatmul.mubr.msk.bf16.vlgmr.msra.gmra.mxu0 %vm102_vm0, %v150_v33 }
 0x148   :  { %2330 = vmatprep.mubr.msk.bf16.mxu0 %vm2634_vm1, %v2633_v15 }
 0x207   :  { %v207_v35 = vpop.f32.mrf.mxu0 }
 0x208   :  { %v208_v36 = vadd.f32 %v2140_v34, %v207_v35 }
 0x209   :  { %v2320_v37 = vpop.f32.mrf.mxu0 }
 0x20a   :  { %v2789_v38 = vpack.c.bf16 %v208_v36, %v208_v36 }
 0x20b   :  { %v210_v39 = vpop.f32.mrf.mxu0 }
 0x20c   :  { %v211_v40 = vadd.f32 %v2140_v34, %v210_v39  ;;  %220 = vrot.lane.b32.xlu0 %v2789_v38, %s2635_s24 }
 0x20d   :  { %v2321_v41 = vpop.f32.mrf.mxu0 }
 0x20e   :  { %v2793_v42 = vpack.c.bf16 %v211_v40, %v211_v40 }
 0x210   :  { %222 = vrot.lane.b32.xlu1 %v2793_v42, %s2635_s24 }
 0x214   :  { %224 = vrot.lane.b32.xlu1 %v2789_v38, %s2636_s2 }
 0x218   :  { %273 = vrot.lane.b32.xlu1 %v2793_v42, %s2636_s2 }
 0x27e   :  { %v221_v43 = vpop.permute.xlu0 %220 }
 0x27f   :  { %v2801_v44 = vcombine.low %v221_v43, %v221_v43 }
 0x281   :  { %323 = vrot.lane.b32.xlu0 %v2801_v44, %s2636_s2 }
 0x282   :  { %v223_v45 = vpop.permute.xlu1 %222 }
 0x283   :  { %v2805_v46 = vcombine.low %v223_v45, %v223_v45 }
 0x285   :  { %373 = vrot.lane.b32.xlu1 %v2805_v46, %s2636_s2 }
 0x286   :  { %v225_v47 = vpop.permute.xlu1 %224 }
 0x287   :  { %v231_v48 = vsel %vm226_vm2, %v225_v47, 0 }
 0x288   :  { %2323 = vmatpush3.bf16.xpose.msra.mxu1 %v231_v48 }
 0x289   :  { %2334 = vmatprep.subr.bf16.mxu1 %v2633_v15 }
 0x28a   :  { %v274_v49 = vpop.permute.xlu1 %273 }
 0x28b   :  { %v279_v50 = vsel %vm226_vm2, %v274_v49, 0 }
 0x28c   :  { %2329 = vmatpush3.bf16.xpose.msra.mxu0 %v279_v50 }
 0x28d   :  { %2340 = vmatprep.subr.bf16.mxu0 %v2633_v15 }
 0x28f   :  { %2325 = vmatmul.mubr.msk.bf16.vlgmr.msra.gmra.mxu1 %vm226_vm2, %v2789_v38 }
 0x290   :  { %2336 = vmatprep.mubr.msk.bf16.mxu1 %vm2634_vm1, %v2633_v15 }
 0x293   :  { %2331 = vmatmul.mubr.msk.bf16.vlgmr.msra.gmra.mxu0 %vm226_vm2, %v2793_v42 }
 0x294   :  { %2342 = vmatprep.mubr.msk.bf16.mxu0 %vm2634_vm1, %v2633_v15 }
 0x2f3   :  { %v324_v51 = vpop.permute.xlu0 %323 }
 0x2f4   :  { %v329_v52 = vsel %vm226_vm2, %v324_v51, 0 }
 0x2f5   :  { %2335 = vmatpush3.bf16.xpose.msra.mxu1 %v329_v52 }
 0x2f6   :  { %2346 = vmatprep.subr.bf16.mxu1 %v2633_v15 }
 0x2f7   :  { %v374_v53 = vpop.permute.xlu1 %373 }
 0x2f8   :  { %v379_v54 = vsel %vm226_vm2, %v374_v53, 0 }
 0x2f9   :  { %2341 = vmatpush3.bf16.xpose.msra.mxu0 %v379_v54 }
 0x2fa   :  { %2352 = vmatprep.subr.bf16.mxu0 %v2633_v15 }
 0x2fc   :  { %2337 = vmatmul.mubr.msk.bf16.vlgmr.msra.gmra.mxu1 %vm226_vm2, %v221_v43 }
 0x2fd   :  { %2348 = vmatprep.mubr.msk.bf16.mxu1 %vm2634_vm1, %v2633_v15 }
 0x300   :  { %2343 = vmatmul.mubr.msk.bf16.vlgmr.msra.gmra.mxu0 %vm226_vm2, %v223_v45 }
 0x301   :  { %2354 = vmatprep.mubr.msk.bf16.mxu0 %vm2634_vm1, %v2633_v15 }
 0x34f   :  { %v267_v6 = vpop.f32.mrf.mxu1 }
 0x350   :  { %v421_v7 = vmul.f32 0.25, %v267_v6 }
 0x351   :  { %v2326_v8 = vpop.f32.mrf.mxu1 }
 0x352   :  { %v445_v9 = vadd.f32 %v2834_v4, %v421_v7 }
 0x353   :  { %v270_v11 = vpop.f32.mrf.mxu1  ;;  %v315_v12 = vpop.f32.mrf.mxu0 }
 0x354   :  { %v422_v13 = vmul.f32 0.25, %v315_v12  ;;  %v450_v14 = vsel %vm449_vm4, %v445_v9, -inf }
 0x355   :  { %v2327_v16 = vpop.f32.mrf.mxu1  ;;  %v2332_v17 = vpop.f32.mrf.mxu0  ;;  %451 = vmax.xlane.f32.xlu0 %v450_v14 }
 0x356   :  { %v446_v18 = vadd.f32 %v2837_v10, %v422_v13 }
 0x357   :  { %v318_v19 = vpop.f32.mrf.mxu0 }
 0x358   :  { %v453_v20 = vsel %vm449_vm4, %v446_v18, -inf }
 0x359   :  { %v2333_v21 = vpop.f32.mrf.mxu0  ;;  %454 = vmax.xlane.f32.xlu1 %v453_v20 }
 0x3bc   :  { %v365_v25 = vpop.f32.mrf.mxu1 }
 0x3bd   :  { %v423_v26 = vmul.f32 0.25, %v365_v25 }
 0x3be   :  { %v2338_v27 = vpop.f32.mrf.mxu1 }
 0x3bf   :  { %v447_v28 = vadd.f32 %v2842_v23, %v423_v26  ;;  %v2519_v26 = vld [vmem:[%s3179_s6 + $0x8] sm:$0xff]  }
 0x3c0   :  { %v368_v30 = vpop.f32.mrf.mxu1  ;;  %v415_v33 = vpop.f32.mrf.mxu0 }
 0x3c1   :  { %v424_v34 = vmul.f32 0.25, %v415_v33  ;;  %v456_v35 = vsel %vm449_vm4, %v447_v28, -inf }
 0x3c2   :  { %v2339_v36 = vpop.f32.mrf.mxu1  ;;  %v2344_v37 = vpop.f32.mrf.mxu0  ;;  %457 = vmax.xlane.f32.xlu0 %v456_v35 }
 0x3c3   :  { %v448_v39 = vadd.f32 %v2845_v29, %v424_v34  ;;  %v2520_v37 = vld [vmem:[%s3179_s6] sm:$0xff]  }
 0x3c4   :  { %v418_v40 = vpop.f32.mrf.mxu0 }
 0x3c5   :  { %v459_v41 = vsel %vm449_vm4, %v448_v39, -inf }
 0x3c6   :  { %v2345_v43 = vpop.f32.mrf.mxu0  ;;  %460 = vmax.xlane.f32.xlu0 %v459_v41 }
 0x3de   :  { %v452_v45 = vpop.xlane.xlu0 %451 }
 0x3df   :  { %v462_v47 = vsub.f32 %v445_v9, %v452_v45 }
 0x3e1   :  { %v466_v48 = vmul.f32 1.442695, %v462_v47 }
 0x3e2   :  { %v455_v49 = vpop.xlane.xlu1 %454 }
 0x3e3   :  { %2545 = vpow2.f32 %v466_v48  ;;  %v463_v50 = vsub.f32 %v446_v18, %v455_v49 }
 0x3e5   :  { %v468_v51 = vmul.f32 1.442695, %v463_v50 }
 0x3e7   :  { %2547 = vpow2.f32 %v468_v51 }
 0x3f0   :  { %v2546_v52 = vpop.eup %2545 }
 0x3f1   :  { %v474_v53 = vsel %vm449_vm4, %v2546_v52, 0.0 }
 0x3f2   :  { %475 = vadd.xlane.f32.xlu0 %v474_v53 }
 0x3f4   :  { %v2548_v54 = vpop.eup %2547 }
 0x3f5   :  { %v477_v55 = vsel %vm449_vm4, %v2548_v54, 0.0 }
 0x3f6   :  { %478 = vadd.xlane.f32.xlu1 %v477_v55 }
 0x407   :  { %547 = vrot.lane.b32.xlu1 %v2793_v42, %s2638_s28 }
 0x40b   :  { %595 = vrot.lane.b32.xlu1 %v2801_v44, %s2638_s28 }
 0x44b   :  { %v458_v56 = vpop.xlane.xlu0 %457 }
 0x44c   :  { %v464_v57 = vsub.f32 %v447_v28, %v458_v56 }
 0x44e   :  { %v470_v58 = vmul.f32 1.442695, %v464_v57 }
 0x44f   :  { %v461_v59 = vpop.xlane.xlu0 %460 }
 0x450   :  { %2549 = vpow2.f32 %v470_v58  ;;  %v465_v60 = vsub.f32 %v448_v39, %v461_v59  ;;  %v2156_v58 = vld [vmem:[%s3180_s7] ss:$0 sm:$0xff] }
 0x452   :  { %v472_v61 = vmul.f32 1.442695, %v465_v60 }
 0x454   :  { %2551 = vpow2.f32 %v472_v61 }
 0x45d   :  { %v2550_v62 = vpop.eup %2549 }
 0x45e   :  { %v480_v63 = vsel %vm449_vm4, %v2550_v62, 0.0 }
 0x45f   :  { %481 = vadd.xlane.f32.xlu0 %v480_v63 }
 0x461   :  { %v2552_v0 = vpop.eup %2551 }
 0x462   :  { %v483_v1 = vsel %vm449_vm4, %v2552_v0, 0.0 }
 0x463   :  { %484 = vadd.xlane.f32.xlu1 %v483_v1 }
 0x474   :  { %643 = vrot.lane.b32.xlu1 %v2805_v46, %s2638_s28 }
 0x475   :  { %498 = vrot.lane.b32.xlu0 %v2789_v38, %s2638_s28 }
 0x47b   :  { %v476_v46 = vpop.xlane.xlu0 %475 }
 0x47f   :  { %v479_v42 = vpop.xlane.xlu1 %478 }
 0x480   :  { %2553 = vrcp.f32 %v479_v42 }
 0x481   :  { %2555 = vrcp.f32 %v476_v46 }
 0x483   :  { %v548_v44 = vpop.permute.xlu1 %547 }
 0x484   :  { %v553_v2 = vsel %vm503_vm5, %v548_v44, 0 }
 0x485   :  { %2353 = vmatpush3.bf16.msra.mxu0 %v553_v2 }
 0x486   :  { %2364 = vmatprep.subr.bf16.mxu0 %v2633_v15 }
 0x487   :  { %v596_v7 = vpop.permute.xlu1 %595 }
 0x488   :  { %v601_v17 = vsel %vm503_vm5, %v596_v7, 0 }
 0x48d   :  { %v2554_v3 = vpop.eup %2553 }
 0x48e   :  { %v491_v5 = vmul.f32 %v2554_v3, %v2548_v54  ;;  %v2556_v38 = vpop.eup %2555 }
 0x48f   :  { %v490_v9 = vmul.f32 %v2556_v38, %v2546_v52 }
 0x490   :  { %v495_v6 = vpack.c.bf16 %v491_v5, %v491_v5 }
 0x491   :  { %v494_v14 = vpack.c.bf16 %v490_v9, %v490_v9 }
 0x492   :  { %2355 = vmatmul.mubr.msk.bf16.vlgmr.msra.gmra.mxu0 %vm449_vm4, %v495_v6 }
 0x493   :  { %2366 = vmatprep.mubr.msk.bf16.mxu0 %vm2634_vm1, %v2633_v15 }
 0x4e8   :  { %v482_v8 = vpop.xlane.xlu0 %481 }
 0x4e9   :  { %2557 = vrcp.f32 %v482_v8 }
 0x4ec   :  { %v485_v11 = vpop.xlane.xlu1 %484  ;;  %v499_v12 = vpop.permute.xlu0 %498 }
 0x4ed   :  { %2559 = vrcp.f32 %v485_v11  ;;  %v505_v13 = vsel %vm503_vm5, %v499_v12, 0  ;;  %v2522_v12 = vld [vmem:[%s3183_s10] sm:$0xff]  }
 0x4ee   :  { %2347 = vmatpush3.bf16.msra.mxu1 %v505_v13 }
 0x4ef   :  { %2358 = vmatprep.subr.bf16.mxu1 %v2633_v15 }
 0x4f0   :  { %v644_v16 = vpop.permute.xlu1 %643 }
 0x4f1   :  { %v649_v18 = vsel %vm503_vm5, %v644_v16, 0  ;;  %2349 = vmatmul.mubr.msk.bf16.vlgmr.msra.gmra.mxu1 %vm449_vm4, %v494_v14 }
 0x4f2   :  { %2359 = vmatpush3.bf16.msra.mxu1 %v601_v17  ;;  %2365 = vmatpush3.bf16.msra.mxu0 %v649_v18 }
 0x4f3   :  { %2360 = vmatprep.mubr.msk.bf16.mxu1 %vm2634_vm1, %v2633_v15  ;;  %2370 = vmatprep.subr.bf16.mxu1 %v2633_v15 }
 0x4f4   :  { %2378 = vmatprep.subr.bf16.mxu0 %v2633_v15 }
 0x4f6   :  { %v2558_v19 = vpop.eup %2557 }
 0x4f7   :  { %v492_v20 = vmul.f32 %v2558_v19, %v2550_v62 }
 0x4f9   :  { %v496_v21 = vpack.c.bf16 %v492_v20, %v492_v20 }
 0x4fa   :  { %v2560_v22 = vpop.eup %2559 }
 0x4fb   :  { %2361 = vmatmul.mubr.msk.bf16.vlgmr.msra.gmra.mxu1 %vm449_vm4, %v496_v21  ;;  %v493_v24 = vmul.f32 %v2560_v22, %v2552_v0  ;;  %v2160_v22 = vld [vmem:[%s3181_s8] ss:$0 sm:$0xff] }
 0x4fc   :  { %2374 = vmatprep.mubr.msk.bf16.mxu1 %vm2634_vm1, %v2633_v15  ;;  %2371 = vmatpush3.bf16.msra.mxu1 %v2519_v26 }
 0x4fd   :  { %v497_v25 = vpack.c.bf16 %v493_v24, %v493_v24  ;;  %2372 = vmatprep.subr.bf16.mxu1 %v2633_v15 }
 0x4ff   :  { %2367 = vmatmul.mubr.msk.bf16.vlgmr.msra.gmra.mxu0 %vm449_vm4, %v497_v25 }
 0x500   :  { %2382 = vmatprep.mubr.msk.bf16.mxu0 %vm2634_vm1, %v2633_v15  ;;  %2373 = vmatpush3.bf16.msra.mxu1 %v2520_v37  ;;  %v2525_v37 = vld [vmem:[%s3185_s12 + $0x8] sm:$0xff]  }
 0x501   :  { %2386 = vmatprep.subr.bf16.mxu1 %v2633_v15 }
 0x552   :  { %v589_v27 = vpop.f32.mrf.mxu0 }
 0x554   :  { %v2356_v28 = vpop.f32.mrf.mxu0 }
 0x556   :  { %v592_v30 = vpop.f32.mrf.mxu0 }
 0x558   :  { %v2357_v33 = vpop.f32.mrf.mxu0 }
 0x5b1   :  { %v541_v34 = vpop.f32.mrf.mxu1 }
 0x5b3   :  { %v2350_v35 = vpop.f32.mrf.mxu1 }
 0x5b4   :  { %v2523_v35 = vld [vmem:[%s3185_s12 + $0x18] sm:$0xff]  }
 0x5b5   :  { %v544_v36 = vpop.f32.mrf.mxu1 }
 0x5b6   :  { %v2524_v36 = vld [vmem:[%s3185_s12 + $0x10] sm:$0xff]  }
 0x5b7   :  { %v2351_v39 = vpop.f32.mrf.mxu1 }
 0x5b8   :  { %v2526_v39 = vld [vmem:[%s3185_s12] sm:$0xff]  }
 0x5bb   :  { %v637_v40 = vpop.f32.mrf.mxu1 }
 0x5bd   :  { %v2362_v41 = vpop.f32.mrf.mxu1 }
 0x5bf   :  { %v640_v43 = vpop.f32.mrf.mxu1  ;;  %v685_v45 = vpop.f32.mrf.mxu0 }
 0x5c0   :  { %v2507_v47 = vpack.i.bf16 %v685_v45, %v637_v40  ;;  %v2162_v40 = vld [vmem:[%s3184_s11] ss:$0 sm:$0xff] }
 0x5c1   :  { %v2363_v48 = vpop.f32.mrf.mxu1  ;;  %v2368_v49 = vpop.f32.mrf.mxu0 }
 0x5c2   :  { %2508 = vrot.lane.b32.xlu0 %v2507_v47, %s2639_s21 }
 0x5c3   :  { %v688_v50 = vpop.f32.mrf.mxu0 }
 0x5c5   :  { %v2369_v51 = vpop.f32.mrf.mxu0 }
 0x634   :  { %v2509_v52 = vpop.permute.xlu0 %2508 }
 0x635   :  { %v2511_v53 = vunpack.i.h.bf16 %v2509_v52  ;;  %v2510_v54 = vunpack.i.l.bf16 %v2509_v52 }
 0x637   :  { %v700_v55 = vsel %vm226_vm2, %v589_v27, %v2511_v53  ;;  %v699_v56 = vsel %vm226_vm2, %v541_v34, %v2510_v54  ;;  %v2161_v27 = vld [vmem:[%s3182_s9] ss:$0 sm:$0xff] }
 0x638   :  { %v705_v57 = vpack.c.bf16 %v700_v55, %v699_v56 }
 0x63a   :  { %2375 = vmatmul.mubr.msk.bf16.vlgmr.msra.gmra.mxu1 %vm102_vm0, %v705_v57 }
 0x63b   :  { %2394 = vmatprep.mubr.msk.bf16.mxu1 %vm2634_vm1, %v2633_v15  ;;  %2387 = vmatpush3.bf16.msra.mxu1 %v2523_v35 }
 0x63c   :  { %2388 = vmatprep.subr.bf16.mxu1 %v2633_v15 }
 0x63f   :  { %2389 = vmatpush3.bf16.msra.mxu1 %v2524_v36 }
 0x640   :  { %2390 = vmatprep.subr.bf16.mxu1 %v2633_v15 }
 0x643   :  { %2391 = vmatpush3.bf16.msra.mxu1 %v2525_v37 }
 0x644   :  { %2392 = vmatprep.subr.bf16.mxu1 %v2633_v15 }
 0x647   :  { %2393 = vmatpush3.bf16.msra.mxu1 %v2526_v39 }
 0x648   :  { %2412 = vmatprep.subr.bf16.mxu1 %v2633_v15 }
 0x6fa   :  { %v762_v59 = vpop.f32.mrf.mxu1 }
 0x6fb   :  { %v763_v60 = vadd.f32 %v2156_v58, %v762_v59 }
 0x6fc   :  { %v2376_v61 = vpop.f32.mrf.mxu1 }
 0x6fd   :  { %v769_v62 = vadd.f32 %v763_v60, %v2777_v31 }
 0x6fe   :  { %v765_v63 = vpop.f32.mrf.mxu1 }
 0x6ff   :  { %v766_v0 = vadd.f32 %v2156_v58, %v765_v63  ;;  %v773_v1 = vsel %vm102_vm0, %v769_v62, 0.0 }
 0x700   :  { %774 = vadd.xlane.f32.xlu1 %v773_v1  ;;  %v2377_v42 = vpop.f32.mrf.mxu1 }
 0x701   :  { %v770_v44 = vadd.f32 %v766_v0, %v2779_v32  ;;  %v2521_v32 = vld [vmem:[%s3183_s10 + $0x8] sm:$0xff]  }
 0x702   :  { %2379 = vmatpush3.bf16.msra.mxu0 %v2521_v32 }
 0x703   :  { %v776_v2 = vsel %vm102_vm0, %v770_v44, 0.0  ;;  %2380 = vmatprep.subr.bf16.mxu0 %v2633_v15 }
 0x704   :  { %777 = vadd.xlane.f32.xlu0 %v776_v2 }
 0x706   :  { %2381 = vmatpush3.bf16.msra.mxu0 %v2522_v12 }
 0x707   :  { %2398 = vmatprep.subr.bf16.mxu0 %v2633_v15 }
 0x789   :  { %v775_v3 = vpop.xlane.xlu1 %774 }
 0x78a   :  { %v779_v5 = vmul.f32 0.03125, %v775_v3 }
 0x78c   :  { %v781_v6 = vsub.f32 %v769_v62, %v779_v5 }
 0x78d   :  { %v778_v46 = vpop.xlane.xlu0 %777 }
 0x78e   :  { %v780_v38 = vmul.f32 0.03125, %v778_v46  ;;  %v783_v7 = vmul.f32 %v781_v6, %v781_v6 }
 0x790   :  { %v782_v8 = vsub.f32 %v770_v44, %v780_v38  ;;  %v785_v31 = vsel %vm102_vm0, %v783_v7, 0.0 }
 0x791   :  { %786 = vadd.xlane.f32.xlu0 %v785_v31 }
 0x792   :  { %v784_v9 = vmul.f32 %v782_v8, %v782_v8 }
 0x794   :  { %v788_v11 = vsel %vm102_vm0, %v784_v9, 0.0 }
 0x795   :  { %789 = vadd.xlane.f32.xlu0 %v788_v11 }
 0x81a   :  { %v787_v13 = vpop.xlane.xlu0 %786 }
 0x81b   :  { %v791_v14 = vmul.f32 0.03125, %v787_v13 }
 0x81d   :  { %v793_v16 = vadd.f32 1e-12, %v791_v14 }
 0x81e   :  { %v790_v17 = vpop.xlane.xlu0 %789 }
 0x81f   :  { %2561 = vrsqrt.f32 %v793_v16  ;;  %v792_v18 = vmul.f32 0.03125, %v790_v17 }
 0x821   :  { %v794_v19 = vadd.f32 1e-12, %v792_v18 }
 0x823   :  { %2563 = vrsqrt.f32 %v794_v19 }
 0x82c   :  { %v2562_v20 = vpop.eup %2561 }
 0x82d   :  { %v797_v21 = vmul.f32 %v2562_v20, %v781_v6 }
 0x82f   :  { %v805_v26 = vmul.f32 %v2160_v22, %v797_v21  ;;  %v2640_v21 = vmov 1.0  }
 0x830   :  { %v2564_v24 = vpop.eup %2563 }
 0x831   :  { %v798_v25 = vmul.f32 %v2564_v24, %v782_v8  ;;  %v2919_v30 = vadd.f32 %v2161_v27, %v805_v26 }
 0x833   :  { %v806_v28 = vmul.f32 %v2160_v22, %v798_v25 }
 0x835   :  { %v2921_v33 = vadd.f32 %v2161_v27, %v806_v28 }
 0x837   :  { %v819_v34 = vpack.c.bf16 %v2921_v33, %v2919_v30 }
 0x839   :  { %2383 = vmatmul.mubr.msk.bf16.vlgmr.msra.gmra.mxu0 %vm102_vm0, %v819_v34 }
 0x83a   :  { %2402 = vmatprep.mubr.msk.bf16.mxu0 %vm2634_vm1, %v2633_v15 }
 0x8f9   :  { %v876_v41 = vpop.f32.mrf.mxu0 }
 0x8fa   :  { %v877_v43 = vadd.f32 %v2162_v40, %v876_v41 }
 0x8fb   :  { %v2384_v45 = vpop.f32.mrf.mxu0 }
 0x8fc   :  { %v885_v47 = vmul.f32 0.70710677, %v877_v43  ;;  %v883_v35 = vmul.f32 0.5, %v877_v43  ;;  %v2166_v45 = vld [vmem:[%s3186_s13] ss:$0 sm:$0xff] }
 0x8fd   :  { %v879_v48 = vpop.f32.mrf.mxu0 }
 0x8fe   :  { %v891_v49 = vand.u32 2147483647, %v885_v47  ;;  %v880_v50 = vadd.f32 %v2162_v40, %v879_v48  ;;  %vm887_vm6 = vcmp.lt.f32.partialorder %v885_v47, 0.0 }
 0x8ff   :  { %v2385_v51 = vpop.f32.mrf.mxu0  ;;  %v889_v22 = vsel %vm887_vm6, -1.0, %v2640_v21 }
 0x900   :  { %v893_v52 = vmul.f32 0.3275911, %v891_v49  ;;  %v886_v53 = vmul.f32 0.70710677, %v880_v50  ;;  %v919_v58 = vsub.f32 0.0, %v891_v49  ;;  %v884_v36 = vmul.f32 0.5, %v880_v50 }
 0x902   :  { %v895_v54 = vadd.f32 1.0, %v893_v52  ;;  %v892_v55 = vand.u32 2147483647, %v886_v53  ;;  %v921_v59 = vmul.f32 %v919_v58, %v891_v49  ;;  %vm888_vm7 = vcmp.lt.f32.partialorder %v886_v53, 0.0 }
 0x903   :  { %v890_v27 = vsel %vm888_vm7, -1.0, %v2640_v21 }
 0x904   :  { %2565 = vrcp.f32 %v895_v54  ;;  %v894_v56 = vmul.f32 0.3275911, %v892_v55  ;;  %v920_v60 = vsub.f32 0.0, %v892_v55  ;;  %v923_v63 = vmul.f32 1.442695, %v921_v59 }
 0x906   :  { %v896_v57 = vadd.f32 1.0, %v894_v56  ;;  %v922_v0 = vmul.f32 %v920_v60, %v892_v55 }
 0x908   :  { %2567 = vrcp.f32 %v896_v57  ;;  %v925_v3 = vmul.f32 1.442695, %v922_v0 }
 0x909   :  { %2569 = vpow2.f32 %v923_v63 }
 0x90a   :  { %2571 = vpow2.f32 %v925_v3 }
 0x911   :  { %v2566_v61 = vpop.eup %2565 }
 0x912   :  { %v901_v62 = vmul.f32 1.0614054, %v2566_v61 }
 0x914   :  { %v903_v1 = vadd.f32 -1.4531521, %v901_v62 }
 0x915   :  { %v2568_v42 = vpop.eup %2567 }
 0x916   :  { %v905_v44 = vmul.f32 %v2566_v61, %v903_v1  ;;  %v902_v2 = vmul.f32 1.0614054, %v2568_v42  ;;  %v2570_v14 = vpop.eup %2569  ;;  %v2528_v1 = vld [vmem:[%s3202_s26 + $0x10] sm:$0xff]  }
 0x917   :  { %v2572_v20 = vpop.eup %2571 }
 0x918   :  { %v907_v5 = vadd.f32 1.4214138, %v905_v44  ;;  %v904_v6 = vadd.f32 -1.4531521, %v902_v2 }
 0x91a   :  { %v909_v46 = vmul.f32 %v2566_v61, %v907_v5  ;;  %v906_v38 = vmul.f32 %v2568_v42, %v904_v6 }
 0x91c   :  { %v911_v7 = vadd.f32 -0.28449672, %v909_v46  ;;  %v908_v8 = vadd.f32 1.4214138, %v906_v38 }
 0x91e   :  { %v913_v31 = vmul.f32 %v2566_v61, %v911_v7  ;;  %v910_v9 = vmul.f32 %v2568_v42, %v908_v8  ;;  %v2172_v7 = vld [vmem:[%s3187_s14] ss:$0 sm:$0xff] }
 0x920   :  { %v915_v11 = vadd.f32 0.2548296, %v913_v31  ;;  %v912_v32 = vadd.f32 -0.28449672, %v910_v9 }
 0x922   :  { %v917_v12 = vmul.f32 %v2566_v61, %v915_v11  ;;  %v914_v13 = vmul.f32 %v2568_v42, %v912_v32  ;;  %v2173_v11 = vld [vmem:[%s3188_s15] ss:$0 sm:$0xff] }
 0x924   :  { %v927_v16 = vmul.f32 %v2570_v14, %v917_v12  ;;  %v916_v17 = vadd.f32 0.2548296, %v914_v13 }
 0x926   :  { %v929_v18 = vsub.f32 1.0, %v927_v16  ;;  %v918_v19 = vmul.f32 %v2568_v42, %v916_v17  ;;  %v2179_v16 = vld [vmem:[%s3178_s5 + $0x1] ss:$0 sm:$0xff] }
 0x928   :  { %v931_v24 = vmul.f32 %v929_v18, %v889_v22  ;;  %v928_v25 = vmul.f32 %v2572_v20, %v918_v19 }
 0x92a   :  { %v930_v26 = vsub.f32 1.0, %v928_v25  ;;  %v933_v28 = vadd.f32 1.0, %v931_v24 }
 0x92c   :  { %v932_v34 = vmul.f32 %v930_v26, %v890_v27  ;;  %v935_v39 = vmul.f32 %v933_v28, %v883_v35 }
 0x92e   :  { %v934_v37 = vadd.f32 1.0, %v932_v34 }
 0x930   :  { %v936_v40 = vmul.f32 %v934_v37, %v884_v36 }
 0x932   :  { %v945_v41 = vpack.c.bf16 %v936_v40, %v935_v39 }
 0x934   :  { %2395 = vmatmul.mubr.msk.bf16.vlgmr.msra.gmra.mxu1 %vm977_vm8, %v945_v41 }
 0x935   :  { %2414 = vmatprep.mubr.msk.bf16.mxu1 %vm2634_vm1, %v2633_v15 }
 0x9f4   :  { %v1015_v47 = vpop.f32.mrf.mxu1 }
 0x9f5   :  { %v1016_v48 = vadd.f32 %v2166_v45, %v1015_v47 }
 0x9f6   :  { %v2396_v49 = vpop.f32.mrf.mxu1 }
 0x9f7   :  { %v1022_v43 = vadd.f32 %v1016_v48, %v2919_v30 }
 0x9f8   :  { %v1018_v50 = vpop.f32.mrf.mxu1 }
 0x9f9   :  { %v1019_v51 = vadd.f32 %v2166_v45, %v1018_v50  ;;  %v1026_v52 = vsel %vm102_vm0, %v1022_v43, 0.0 }
 0x9fa   :  { %1027 = vadd.xlane.f32.xlu1 %v1026_v52  ;;  %v2397_v53 = vpop.f32.mrf.mxu1 }
 0x9fb   :  { %v1023_v54 = vadd.f32 %v1019_v51, %v2921_v33  ;;  %v2527_v33 = vld [vmem:[%s3202_s26 + $0x18] sm:$0xff]  }
 0x9fc   :  { %2399 = vmatpush3.bf16.msra.mxu0 %v2527_v33 }
 0x9fd   :  { %v1029_v55 = vsel %vm102_vm0, %v1023_v54, 0.0  ;;  %2400 = vmatprep.subr.bf16.mxu0 %v2633_v15 }
 0x9fe   :  { %1030 = vadd.xlane.f32.xlu0 %v1029_v55 }
 0xa00   :  { %2401 = vmatpush3.bf16.msra.mxu0 %v2528_v1 }
 0xa01   :  { %2406 = vmatprep.subr.bf16.mxu0 %v2633_v15 }
 0xa83   :  { %v1028_v56 = vpop.xlane.xlu1 %1027 }
 0xa84   :  { %v1032_v57 = vmul.f32 0.03125, %v1028_v56 }
 0xa86   :  { %v1034_v58 = vsub.f32 %v1022_v43, %v1032_v57 }
 0xa87   :  { %v1031_v59 = vpop.xlane.xlu0 %1030 }
 0xa88   :  { %v1033_v60 = vmul.f32 0.03125, %v1031_v59  ;;  %v1036_v61 = vmul.f32 %v1034_v58, %v1034_v58 }
 0xa8a   :  { %v1035_v62 = vsub.f32 %v1023_v54, %v1033_v60  ;;  %v1038_v30 = vsel %vm102_vm0, %v1036_v61, 0.0 }
 0xa8b   :  { %1039 = vadd.xlane.f32.xlu1 %v1038_v30 }
 0xa8c   :  { %v1037_v63 = vmul.f32 %v1035_v62, %v1035_v62 }
 0xa8e   :  { %v1041_v0 = vsel %vm102_vm0, %v1037_v63, 0.0 }
 0xa8f   :  { %1042 = vadd.xlane.f32.xlu0 %v1041_v0 }
 0xb14   :  { %v1040_v42 = vpop.xlane.xlu1 %1039 }
 0xb15   :  { %v1044_v44 = vmul.f32 0.03125, %v1040_v42 }
 0xb17   :  { %v1046_v2 = vadd.f32 1e-12, %v1044_v44 }
 0xb18   :  { %v1043_v3 = vpop.xlane.xlu0 %1042 }
 0xb19   :  { %2573 = vrsqrt.f32 %v1046_v2  ;;  %v1045_v5 = vmul.f32 0.03125, %v1043_v3 }
 0xb1b   :  { %v1047_v6 = vadd.f32 1e-12, %v1045_v5 }
 0xb1d   :  { %2575 = vrsqrt.f32 %v1047_v6 }
 0xb26   :  { %v2574_v46 = vpop.eup %2573 }
 0xb27   :  { %v1050_v38 = vmul.f32 %v2574_v46, %v1034_v58 }
 0xb29   :  { %v1058_v9 = vmul.f32 %v2172_v7, %v1050_v38 }
 0xb2a   :  { %v2576_v8 = vpop.eup %2575 }
 0xb2b   :  { %v1051_v31 = vmul.f32 %v2576_v8, %v1035_v62  ;;  %v2975_v12 = vadd.f32 %v2173_v11, %v1058_v9 }
 0xb2d   :  { %v1059_v32 = vmul.f32 %v2172_v7, %v1051_v31 }
 0xb2f   :  { %v2977_v13 = vadd.f32 %v2173_v11, %v1059_v32 }
 0xb31   :  { %v1073_v14 = vpack.c.bf16 %v2977_v13, %v2975_v12 }
 0xb33   :  { %2403 = vmatmul.mubr.msk.bf16.vlgmr.msra.gmra.mxu0 %vm102_vm0, %v1073_v14 }
 0xb34   :  { %2408 = vmatprep.mubr.msk.bf16.mxu0 %vm2634_vm1, %v2633_v15 }
 0xbf3   :  { %v1131_v17 = vpop.f32.mrf.mxu0 }
 0xbf4   :  { %v1132_v18 = vadd.f32 %v2179_v16, %v1131_v17 }
 0xbf5   :  { %v2404_v19 = vpop.f32.mrf.mxu0 }
 0xbf6   :  { %v2246_v20 = vpack.c.bf16 %v1132_v18, %v1132_v18 }
 0xbf7   :  { %v1134_v22 = vpop.f32.mrf.mxu0 }
 0xbf8   :  { %v1135_v24 = vadd.f32 %v2179_v16, %v1134_v22  ;;  %1144 = vrot.lane.b32.xlu1 %v2246_v20, %s2635_s24 }
 0xbf9   :  { %v2405_v25 = vpop.f32.mrf.mxu0 }
 0xbfa   :  { %v2988_v26 = vpack.c.bf16 %v1135_v24, %v1135_v24 }
 0xbfc   :  { %1148 = vrot.lane.b32.xlu1 %v2246_v20, %s2636_s2  ;;  %1146 = vrot.lane.b32.xlu0 %v2988_v26, %s2635_s24 }
 0xc00   :  { %1196 = vrot.lane.b32.xlu1 %v2988_v26, %s2636_s2 }
 0xc6a   :  { %v1145_v27 = vpop.permute.xlu1 %1144 }
 0xc6b   :  { %v2995_v28 = vcombine.low %v1145_v27, %v1145_v27 }
 0xc6d   :  { %1246 = vrot.lane.b32.xlu1 %v2995_v28, %s2636_s2 }
 0xc6e   :  { %v1149_v34 = vpop.permute.xlu1 %1148  ;;  %v1147_v35 = vpop.permute.xlu0 %1146 }
 0xc6f   :  { %v1154_v36 = vsel %vm226_vm2, %v1149_v34, 0  ;;  %v3000_v37 = vcombine.low %v1147_v35, %v1147_v35 }
 0xc70   :  { %2407 = vmatpush3.bf16.xpose.msra.mxu0 %v1154_v36 }
 0xc71   :  { %1296 = vrot.lane.b32.xlu0 %v3000_v37, %s2636_s2  ;;  %2418 = vmatprep.subr.bf16.mxu0 %v2633_v15 }
 0xc72   :  { %v1197_v39 = vpop.permute.xlu1 %1196 }
 0xc73   :  { %v1202_v40 = vsel %vm226_vm2, %v1197_v39, 0 }
 0xc74   :  { %2413 = vmatpush3.bf16.xpose.msra.mxu1 %v1202_v40 }
 0xc75   :  { %2424 = vmatprep.subr.bf16.mxu1 %v2633_v15 }
 0xc77   :  { %2409 = vmatmul.mubr.msk.bf16.vlgmr.msra.gmra.mxu0 %vm226_vm2, %v2246_v20 }
 0xc78   :  { %2420 = vmatprep.mubr.msk.bf16.mxu0 %vm2634_vm1, %v2633_v15 }
 0xc7b   :  { %2415 = vmatmul.mubr.msk.bf16.vlgmr.msra.gmra.mxu1 %vm226_vm2, %v2988_v26 }
 0xc7c   :  { %2426 = vmatprep.mubr.msk.bf16.mxu1 %vm2634_vm1, %v2633_v15 }
 0xcdf   :  { %v1247_v41 = vpop.permute.xlu1 %1246 }
 0xce0   :  { %v1252_v45 = vsel %vm226_vm2, %v1247_v41, 0 }
 0xce1   :  { %2419 = vmatpush3.bf16.xpose.msra.mxu0 %v1252_v45 }
 0xce2   :  { %2430 = vmatprep.subr.bf16.mxu0 %v2633_v15 }
 0xce3   :  { %v1297_v47 = vpop.permute.xlu0 %1296 }
 0xce4   :  { %v1302_v48 = vsel %vm226_vm2, %v1297_v47, 0 }
 0xce5   :  { %2425 = vmatpush3.bf16.xpose.msra.mxu1 %v1302_v48 }
 0xce6   :  { %2436 = vmatprep.subr.bf16.mxu1 %v2633_v15 }
 0xce8   :  { %2421 = vmatmul.mubr.msk.bf16.vlgmr.msra.gmra.mxu0 %vm226_vm2, %v1145_v27 }
 0xce9   :  { %2432 = vmatprep.mubr.msk.bf16.mxu0 %vm2634_vm1, %v2633_v15 }
 0xcec   :  { %2427 = vmatmul.mubr.msk.bf16.vlgmr.msra.gmra.mxu1 %vm226_vm2, %v1147_v35 }
 0xced   :  { %2438 = vmatprep.mubr.msk.bf16.mxu1 %vm2634_vm1, %v2633_v15 }
 0xd37   :  { %v1190_v49 = vpop.f32.mrf.mxu0 }
 0xd38   :  { %v1344_v43 = vmul.f32 0.25, %v1190_v49 }
 0xd39   :  { %v2410_v50 = vpop.f32.mrf.mxu0 }
 0xd3a   :  { %v1348_v51 = vadd.f32 %v1344_v43, %v2834_v4 }
 0xd3b   :  { %v1193_v52 = vpop.f32.mrf.mxu0  ;;  %v1238_v53 = vpop.f32.mrf.mxu1 }
 0xd3c   :  { %v1345_v54 = vmul.f32 0.25, %v1238_v53  ;;  %v1352_v55 = vsel %vm449_vm4, %v1348_v51, -inf }
 0xd3d   :  { %1353 = vmax.xlane.f32.xlu1 %v1352_v55  ;;  %v2411_v56 = vpop.f32.mrf.mxu0  ;;  %v2416_v57 = vpop.f32.mrf.mxu1 }
 0xd3e   :  { %v1349_v58 = vadd.f32 %v1345_v54, %v2837_v10 }
 0xd3f   :  { %v1241_v59 = vpop.f32.mrf.mxu1 }
 0xd40   :  { %v1355_v60 = vsel %vm449_vm4, %v1349_v58, -inf }
 0xd41   :  { %1356 = vmax.xlane.f32.xlu0 %v1355_v60  ;;  %v2417_v61 = vpop.f32.mrf.mxu1  ;;  %v2529_v60 = vld [vmem:[%s3179_s6 + $0x18] sm:$0xff]  }
 0xd4e   :  { %1400 = vrot.lane.b32.xlu1 %v2246_v20, %s2638_s28 }
 0xda8   :  { %v1288_v62 = vpop.f32.mrf.mxu0 }
 0xda9   :  { %v1346_v30 = vmul.f32 0.25, %v1288_v62 }
 0xdaa   :  { %v2422_v4 = vpop.f32.mrf.mxu0 }
 0xdab   :  { %v1350_v63 = vadd.f32 %v1346_v30, %v2842_v23 }
 0xdac   :  { %v1291_v0 = vpop.f32.mrf.mxu0  ;;  %v1338_v33 = vpop.f32.mrf.mxu1 }
 0xdad   :  { %v1347_v1 = vmul.f32 0.25, %v1338_v33  ;;  %v1358_v42 = vsel %vm449_vm4, %v1350_v63, -inf  ;;  %v2530_v0 = vld [vmem:[%s3179_s6 + $0x10] sm:$0xff]  }
 0xdae   :  { %v2423_v44 = vpop.f32.mrf.mxu0  ;;  %1359 = vmax.xlane.f32.xlu0 %v1358_v42  ;;  %v2428_v10 = vpop.f32.mrf.mxu1 }
 0xdaf   :  { %v1351_v2 = vadd.f32 %v1347_v1, %v2845_v29 }
 0xdb0   :  { %v1341_v3 = vpop.f32.mrf.mxu1 }
 0xdb1   :  { %v1361_v5 = vsel %vm449_vm4, %v1351_v2, -inf }
 0xdb2   :  { %1362 = vmax.xlane.f32.xlu0 %v1361_v5  ;;  %v2429_v6 = vpop.f32.mrf.mxu1 }
 0xdc6   :  { %v1354_v46 = vpop.xlane.xlu1 %1353 }
 0xdc7   :  { %v1364_v38 = vsub.f32 %v1348_v51, %v1354_v46 }
 0xdc9   :  { %v1368_v7 = vmul.f32 1.442695, %v1364_v38 }
 0xdca   :  { %v1401_v8 = vpop.permute.xlu1 %1400  ;;  %v1357_v23 = vpop.xlane.xlu0 %1356 }
 0xdcb   :  { %2577 = vpow2.f32 %v1368_v7  ;;  %v1406_v31 = vsel %vm503_vm5, %v1401_v8, 0  ;;  %v1365_v9 = vsub.f32 %v1349_v58, %v1357_v23 }
 0xdcc   :  { %2431 = vmatpush3.bf16.msra.mxu0 %v1406_v31 }
 0xdcd   :  { %v1370_v11 = vmul.f32 1.442695, %v1365_v9  ;;  %2442 = vmatprep.subr.bf16.mxu0 %v2633_v15 }
 0xdcf   :  { %2579 = vpow2.f32 %v1370_v11 }
 0xdd8   :  { %v2578_v29 = vpop.eup %2577 }
 0xdd9   :  { %v1376_v32 = vsel %vm449_vm4, %v2578_v29, 0.0 }
 0xdda   :  { %1377 = vadd.xlane.f32.xlu1 %v1376_v32  ;;  %v2200_v32 = vld [vmem:[%s3180_s7 + $0x1] ss:$0 sm:$0xff] }
 0xddc   :  { %v2580_v14 = vpop.eup %2579 }
 0xddd   :  { %v1379_v16 = vsel %vm449_vm4, %v2580_v14, 0.0 }
 0xdde   :  { %1380 = vadd.xlane.f32.xlu0 %v1379_v16 }
 0xe37   :  { %v1360_v17 = vpop.xlane.xlu0 %1359 }
 0xe38   :  { %v1366_v18 = vsub.f32 %v1350_v63, %v1360_v17 }
 0xe3a   :  { %v1372_v19 = vmul.f32 1.442695, %v1366_v18 }
 0xe3b   :  { %v1363_v20 = vpop.xlane.xlu0 %1362 }
 0xe3c   :  { %2581 = vpow2.f32 %v1372_v19  ;;  %v1367_v22 = vsub.f32 %v1351_v2, %v1363_v20 }
 0xe3e   :  { %v1374_v24 = vmul.f32 1.442695, %v1367_v22 }
 0xe40   :  { %2583 = vpow2.f32 %v1374_v24 }
 0xe49   :  { %v2582_v25 = vpop.eup %2581 }
 0xe4a   :  { %v1382_v27 = vsel %vm449_vm4, %v2582_v25, 0.0 }
 0xe4b   :  { %1383 = vadd.xlane.f32.xlu1 %v1382_v27 }
 0xe4d   :  { %v2584_v34 = vpop.eup %2583 }
 0xe4e   :  { %v1385_v35 = vsel %vm449_vm4, %v2584_v34, 0.0 }
 0xe4f   :  { %1386 = vadd.xlane.f32.xlu0 %v1385_v35 }
 0xe5c   :  { %1496 = vrot.lane.b32.xlu1 %v2995_v28, %s2638_s28 }
 0xe60   :  { %1544 = vrot.lane.b32.xlu1 %v3000_v37, %s2638_s28 }
 0xe63   :  { %v1378_v36 = vpop.xlane.xlu1 %1377 }
 0xe64   :  { %2585 = vrcp.f32 %v1378_v36 }
 0xe65   :  { %1448 = vrot.lane.b32.xlu0 %v2988_v26, %s2638_s28 }
 0xe67   :  { %v1381_v45 = vpop.xlane.xlu0 %1380 }
 0xe68   :  { %2587 = vrcp.f32 %v1381_v45 }
 0xe71   :  { %v2586_v39 = vpop.eup %2585 }
 0xe72   :  { %v1392_v40 = vmul.f32 %v2586_v39, %v2578_v29 }
 0xe74   :  { %v1396_v41 = vpack.c.bf16 %v1392_v40, %v1392_v40 }
 0xe75   :  { %v2588_v28 = vpop.eup %2587 }
 0xe76   :  { %2433 = vmatmul.mubr.msk.bf16.vlgmr.msra.gmra.mxu0 %vm449_vm4, %v1396_v41  ;;  %v1393_v26 = vmul.f32 %v2588_v28, %v2580_v14 }
 0xe77   :  { %2444 = vmatprep.mubr.msk.bf16.mxu0 %vm2634_vm1, %v2633_v15 }
 0xe78   :  { %v1397_v52 = vpack.c.bf16 %v1393_v26, %v1393_v26 }
 0xed4   :  { %v1384_v47 = vpop.xlane.xlu1 %1383 }
 0xed5   :  { %2589 = vrcp.f32 %v1384_v47 }
 0xed8   :  { %v1497_v48 = vpop.permute.xlu1 %1496  ;;  %v1387_v37 = vpop.xlane.xlu0 %1386 }
 0xed9   :  { %v1502_v49 = vsel %vm503_vm5, %v1497_v48, 0  ;;  %2591 = vrcp.f32 %v1387_v37  ;;  %v2532_v48 = vld [vmem:[%s3183_s10 + $0x10] sm:$0xff]  }
 0xeda   :  { %2443 = vmatpush3.bf16.msra.mxu0 %v1502_v49 }
 0xedb   :  { %2454 = vmatprep.subr.bf16.mxu0 %v2633_v15 }
 0xedc   :  { %v1449_v43 = vpop.permute.xlu0 %1448  ;;  %v1545_v51 = vpop.permute.xlu1 %1544 }
 0xedd   :  { %v1454_v50 = vsel %vm503_vm5, %v1449_v43, 0  ;;  %v1550_v53 = vsel %vm503_vm5, %v1545_v51, 0 }
 0xede   :  { %2437 = vmatpush3.bf16.msra.mxu1 %v1454_v50 }
 0xedf   :  { %2448 = vmatprep.subr.bf16.mxu1 %v2633_v15 }
 0xee1   :  { %2439 = vmatmul.mubr.msk.bf16.vlgmr.msra.gmra.mxu1 %vm449_vm4, %v1397_v52 }
 0xee2   :  { %v2590_v54 = vpop.eup %2589  ;;  %2449 = vmatpush3.bf16.msra.mxu1 %v1550_v53  ;;  %2450 = vmatprep.mubr.msk.bf16.mxu1 %vm2634_vm1, %v2633_v15 }
 0xee3   :  { %v1394_v55 = vmul.f32 %v2590_v54, %v2582_v25  ;;  %2462 = vmatprep.subr.bf16.mxu1 %v2633_v15  ;;  %v2206_v54 = vld [vmem:[%s3181_s8 + $0x1] ss:$0 sm:$0xff] }
 0xee5   :  { %v1398_v56 = vpack.c.bf16 %v1394_v55, %v1394_v55 }
 0xee6   :  { %v2592_v57 = vpop.eup %2591 }
 0xee7   :  { %2445 = vmatmul.mubr.msk.bf16.vlgmr.msra.gmra.mxu0 %vm449_vm4, %v1398_v56  ;;  %v1395_v58 = vmul.f32 %v2592_v57, %v2584_v34 }
 0xee8   :  { %2458 = vmatprep.mubr.msk.bf16.mxu0 %vm2634_vm1, %v2633_v15  ;;  %2455 = vmatpush3.bf16.msra.mxu0 %v2529_v60 }
 0xee9   :  { %v1399_v59 = vpack.c.bf16 %v1395_v58, %v1395_v58  ;;  %2456 = vmatprep.subr.bf16.mxu0 %v2633_v15  ;;  %v2207_v58 = vld [vmem:[%s3182_s9 + $0x1] ss:$0 sm:$0xff] }
 0xeeb   :  { %2451 = vmatmul.mubr.msk.bf16.vlgmr.msra.gmra.mxu1 %vm449_vm4, %v1399_v59 }
 0xeec   :  { %2466 = vmatprep.mubr.msk.bf16.mxu1 %vm2634_vm1, %v2633_v15  ;;  %2457 = vmatpush3.bf16.msra.mxu0 %v2530_v0  ;;  %v2536_v0 = vld [vmem:[%s3185_s12 + $0x20] sm:$0xff]  }
 0xeed   :  { %2470 = vmatprep.subr.bf16.mxu0 %v2633_v15 }
 0xf36   :  { %v1442_v61 = vpop.f32.mrf.mxu0 }
 0xf38   :  { %v2434_v62 = vpop.f32.mrf.mxu0 }
 0xf3a   :  { %v1445_v30 = vpop.f32.mrf.mxu0 }
 0xf3b   :  { %v2533_v30 = vld [vmem:[%s3185_s12 + $0x38] sm:$0xff]  }
 0xf3c   :  { %v2435_v4 = vpop.f32.mrf.mxu0 }
 0xf3d   :  { %v2534_v4 = vld [vmem:[%s3185_s12 + $0x30] sm:$0xff]  }
 0xfa1   :  { %v1490_v63 = vpop.f32.mrf.mxu1 }
 0xfa3   :  { %v2440_v33 = vpop.f32.mrf.mxu1 }
 0xfa4   :  { %v2213_v33 = vld [vmem:[%s3184_s11 + $0x1] ss:$0 sm:$0xff] }
 0xfa5   :  { %v1493_v1 = vpop.f32.mrf.mxu1 }
 0xfa7   :  { %v2441_v42 = vpop.f32.mrf.mxu1  ;;  %v1538_v44 = vpop.f32.mrf.mxu0 }
 0xfa9   :  { %v2446_v10 = vpop.f32.mrf.mxu0 }
 0xfab   :  { %v1541_v2 = vpop.f32.mrf.mxu0  ;;  %v1586_v3 = vpop.f32.mrf.mxu1 }
 0xfac   :  { %v2512_v5 = vpack.i.bf16 %v1586_v3, %v1538_v44 }
 0xfad   :  { %v2447_v6 = vpop.f32.mrf.mxu0  ;;  %v2452_v46 = vpop.f32.mrf.mxu1 }
 0xfae   :  { %2513 = vrot.lane.b32.xlu1 %v2512_v5, %s2639_s21 }
 0xfaf   :  { %v1589_v38 = vpop.f32.mrf.mxu1 }
 0xfb1   :  { %v2453_v7 = vpop.f32.mrf.mxu1 }
0x1020   :  { %v2514_v8 = vpop.permute.xlu1 %2513 }
0x1021   :  { %v2516_v23 = vunpack.i.h.bf16 %v2514_v8  ;;  %v2515_v31 = vunpack.i.l.bf16 %v2514_v8 }
0x1023   :  { %v1601_v9 = vsel %vm226_vm2, %v1490_v63, %v2516_v23  ;;  %v1600_v11 = vsel %vm226_vm2, %v1442_v61, %v2515_v31  ;;  %v2535_v63 = vld [vmem:[%s3185_s12 + $0x28] sm:$0xff]  }
0x1024   :  { %v1607_v29 = vpack.c.bf16 %v1601_v9, %v1600_v11 }
0x1026   :  { %2459 = vmatmul.mubr.msk.bf16.vlgmr.msra.gmra.mxu0 %vm102_vm0, %v1607_v29 }
0x1027   :  { %2478 = vmatprep.mubr.msk.bf16.mxu0 %vm2634_vm1, %v2633_v15  ;;  %2471 = vmatpush3.bf16.msra.mxu0 %v2533_v30 }
0x1028   :  { %2472 = vmatprep.subr.bf16.mxu0 %v2633_v15 }
0x102b   :  { %2473 = vmatpush3.bf16.msra.mxu0 %v2534_v4 }
0x102c   :  { %2474 = vmatprep.subr.bf16.mxu0 %v2633_v15 }
0x102f   :  { %2475 = vmatpush3.bf16.msra.mxu0 %v2535_v63  ;;  %v2226_v63 = vld [vmem:[%s3186_s13 + $0x1] ss:$0 sm:$0xff] }
0x1030   :  { %2476 = vmatprep.subr.bf16.mxu0 %v2633_v15 }
0x1033   :  { %2477 = vmatpush3.bf16.msra.mxu0 %v2536_v0 }
0x10e6   :  { %v1665_v14 = vpop.f32.mrf.mxu0 }
0x10e7   :  { %v1666_v16 = vadd.f32 %v2200_v32, %v1665_v14 }
0x10e8   :  { %v2460_v17 = vpop.f32.mrf.mxu0 }
0x10e9   :  { %v1672_v18 = vadd.f32 %v1666_v16, %v2975_v12 }
0x10ea   :  { %v1668_v19 = vpop.f32.mrf.mxu0 }
0x10eb   :  { %v1669_v20 = vadd.f32 %v2200_v32, %v1668_v19  ;;  %v1678_v22 = vsel %vm102_vm0, %v1672_v18, 0.0 }
0x10ec   :  { %1679 = vadd.xlane.f32.xlu0 %v1678_v22  ;;  %v2461_v24 = vpop.f32.mrf.mxu0 }
0x10ed   :  { %v1673_v25 = vadd.f32 %v1669_v20, %v2977_v13  ;;  %v2531_v13 = vld [vmem:[%s3183_s10 + $0x18] sm:$0xff]  }
0x10ee   :  { %2463 = vmatpush3.bf16.msra.mxu1 %v2531_v13 }
0x10ef   :  { %v1681_v27 = vsel %vm102_vm0, %v1673_v25, 0.0  ;;  %2464 = vmatprep.subr.bf16.mxu1 %v2633_v15 }
0x10f0   :  { %1682 = vadd.xlane.f32.xlu1 %v1681_v27 }
0x10f2   :  { %2465 = vmatpush3.bf16.msra.mxu1 %v2532_v48 }
0x10f3   :  { %2482 = vmatprep.subr.bf16.mxu1 %v2633_v15 }
0x1175   :  { %v1680_v34 = vpop.xlane.xlu0 %1679 }
0x1176   :  { %v1684_v35 = vmul.f32 0.03125, %v1680_v34 }
0x1178   :  { %v1686_v36 = vsub.f32 %v1672_v18, %v1684_v35 }
0x1179   :  { %v1683_v39 = vpop.xlane.xlu1 %1682 }
0x117a   :  { %v1685_v40 = vmul.f32 0.03125, %v1683_v39  ;;  %v1688_v41 = vmul.f32 %v1686_v36, %v1686_v36 }
0x117c   :  { %v1687_v45 = vsub.f32 %v1673_v25, %v1685_v40  ;;  %v1690_v12 = vsel %vm102_vm0, %v1688_v41, 0.0 }
0x117d   :  { %1691 = vadd.xlane.f32.xlu0 %v1690_v12 }
0x117e   :  { %v1689_v47 = vmul.f32 %v1687_v45, %v1687_v45 }
0x1180   :  { %v1693_v28 = vsel %vm102_vm0, %v1689_v47, 0.0 }
0x1181   :  { %1694 = vadd.xlane.f32.xlu0 %v1693_v28 }
0x1206   :  { %v1692_v37 = vpop.xlane.xlu0 %1691 }
0x1207   :  { %v1696_v49 = vmul.f32 0.03125, %v1692_v37 }
0x1209   :  { %v1698_v26 = vadd.f32 1e-12, %v1696_v49 }
0x120a   :  { %v1695_v43 = vpop.xlane.xlu0 %1694 }
0x120b   :  { %2593 = vrsqrt.f32 %v1698_v26  ;;  %v1697_v50 = vmul.f32 0.03125, %v1695_v43 }
0x120d   :  { %v1699_v51 = vadd.f32 1e-12, %v1697_v50 }
0x120f   :  { %2595 = vrsqrt.f32 %v1699_v51 }
0x1218   :  { %v2594_v52 = vpop.eup %2593 }
0x1219   :  { %v1702_v53 = vmul.f32 %v2594_v52, %v1686_v36 }
0x121b   :  { %v1710_v57 = vmul.f32 %v2206_v54, %v1702_v53 }
0x121c   :  { %v2596_v55 = vpop.eup %2595 }
0x121d   :  { %v1703_v56 = vmul.f32 %v2596_v55, %v1687_v45  ;;  %v3100_v60 = vadd.f32 %v2207_v58, %v1710_v57 }
0x121f   :  { %v1711_v59 = vmul.f32 %v2206_v54, %v1703_v56 }
0x1221   :  { %v3102_v61 = vadd.f32 %v2207_v58, %v1711_v59 }
0x1223   :  { %v1725_v62 = vpack.c.bf16 %v3102_v61, %v3100_v60 }
0x1225   :  { %2467 = vmatmul.mubr.msk.bf16.vlgmr.msra.gmra.mxu1 %vm102_vm0, %v1725_v62 }
0x1226   :  { %2486 = vmatprep.mubr.msk.bf16.mxu1 %vm2634_vm1, %v2633_v15 }
0x12e5   :  { %v1783_v1 = vpop.f32.mrf.mxu1 }
0x12e6   :  { %v1784_v42 = vadd.f32 %v2213_v33, %v1783_v1 }
0x12e7   :  { %v2468_v44 = vpop.f32.mrf.mxu1 }
0x12e8   :  { %v1792_v10 = vmul.f32 0.70710677, %v1784_v42  ;;  %v1790_v57 = vmul.f32 0.5, %v1784_v42 }
0x12e9   :  { %v1786_v2 = vpop.f32.mrf.mxu1 }
0x12ea   :  { %v1798_v3 = vand.u32 2147483647, %v1792_v10  ;;  %v1787_v5 = vadd.f32 %v2213_v33, %v1786_v2  ;;  %vm1794_vm9 = vcmp.lt.f32.partialorder %v1792_v10, 0.0 }
0x12eb   :  { %v2469_v6 = vpop.f32.mrf.mxu1  ;;  %v1796_v50 = vsel %vm1794_vm9, -1.0, %v2640_v21 }
0x12ec   :  { %v1800_v46 = vmul.f32 0.3275911, %v1798_v3  ;;  %v1793_v38 = vmul.f32 0.70710677, %v1787_v5  ;;  %v1826_v9 = vsub.f32 0.0, %v1798_v3  ;;  %v1791_v58 = vmul.f32 0.5, %v1787_v5 }
0x12ee   :  { %v1802_v7 = vadd.f32 1.0, %v1800_v46  ;;  %v1799_v8 = vand.u32 2147483647, %v1793_v38  ;;  %v1828_v11 = vmul.f32 %v1826_v9, %v1798_v3  ;;  %vm1795_vm10 = vcmp.lt.f32.partialorder %v1793_v38, 0.0 }
0x12ef   :  { %v1797_v54 = vsel %vm1795_vm10, -1.0, %v2640_v21 }
0x12f0   :  { %2597 = vrcp.f32 %v1802_v7  ;;  %v1801_v23 = vmul.f32 0.3275911, %v1799_v8  ;;  %v1827_v29 = vsub.f32 0.0, %v1799_v8  ;;  %v1830_v16 = vmul.f32 1.442695, %v1828_v11 }
0x12f2   :  { %v1803_v31 = vadd.f32 1.0, %v1801_v23  ;;  %v1829_v17 = vmul.f32 %v1827_v29, %v1799_v8  ;;  %v2538_v29 = vld [vmem:[%s3189_s16] sm:$0xff]  }
0x12f4   :  { %2599 = vrcp.f32 %v1803_v31  ;;  %v1832_v24 = vmul.f32 1.442695, %v1829_v17 }
0x12f5   :  { %2601 = vpow2.f32 %v1830_v16 }
0x12f6   :  { %2603 = vpow2.f32 %v1832_v24 }
0x12fd   :  { %v2598_v32 = vpop.eup %2597 }
0x12fe   :  { %v1808_v14 = vmul.f32 1.0614054, %v2598_v32 }
0x1300   :  { %v1810_v18 = vadd.f32 -1.4531521, %v1808_v14 }
0x1301   :  { %v2600_v19 = vpop.eup %2599 }
0x1302   :  { %v1812_v20 = vmul.f32 %v2598_v32, %v1810_v18  ;;  %v1809_v22 = vmul.f32 1.0614054, %v2600_v19  ;;  %v2602_v13 = vpop.eup %2601 }
0x1303   :  { %v2604_v43 = vpop.eup %2603 }
0x1304   :  { %v1814_v25 = vadd.f32 1.4214138, %v1812_v20  ;;  %v1811_v27 = vadd.f32 -1.4531521, %v1809_v22  ;;  %v2234_v22 = vld [vmem:[%s3187_s14 + $0x1] ss:$0 sm:$0xff] }
0x1306   :  { %v1816_v34 = vmul.f32 %v2598_v32, %v1814_v25  ;;  %v1813_v35 = vmul.f32 %v2600_v19, %v1811_v27 }
0x1308   :  { %v1818_v36 = vadd.f32 -0.28449672, %v1816_v34  ;;  %v1815_v39 = vadd.f32 1.4214138, %v1813_v35  ;;  %v2235_v34 = vld [vmem:[%s3188_s15 + $0x1] ss:$0 sm:$0xff] }
0x130a   :  { %v1820_v40 = vmul.f32 %v2598_v32, %v1818_v36  ;;  %v1817_v41 = vmul.f32 %v2600_v19, %v1815_v39 }
0x130c   :  { %v1822_v45 = vadd.f32 0.2548296, %v1820_v40  ;;  %v1819_v12 = vadd.f32 -0.28449672, %v1817_v41 }
0x130e   :  { %v1824_v47 = vmul.f32 %v2598_v32, %v1822_v45  ;;  %v1821_v28 = vmul.f32 %v2600_v19, %v1819_v12 }
0x1310   :  { %v1834_v48 = vmul.f32 %v2602_v13, %v1824_v47  ;;  %v1823_v37 = vadd.f32 0.2548296, %v1821_v28 }
0x1312   :  { %v1836_v49 = vsub.f32 1.0, %v1834_v48  ;;  %v1825_v26 = vmul.f32 %v2600_v19, %v1823_v37  ;;  %v2539_v37 = vld [vmem:[%s3191_s18 + $0x8] sm:$0xff]  }
0x1314   :  { %v1838_v51 = vmul.f32 %v1836_v49, %v1796_v50  ;;  %v1835_v52 = vmul.f32 %v2604_v43, %v1825_v26  ;;  %v2540_v49 = vld [vmem:[%s3191_s18] sm:$0xff]   ;;  %s2641_s18 = smov [#allocation2]  }
0x1315   :  { %v2236_v26 = vld [vmem:[%s3190_s17] ss:$0 sm:$0xff]  ;;  %s2130_s29 = sshll.u32 %s2641_s18, 4  ;;  %s2131_s29 = int_to_ptr.vmem [resolvable:$true] %s2130_s29 }
0x1316   :  { %v1837_v53 = vsub.f32 1.0, %v1835_v52  ;;  %v1840_v55 = vadd.f32 1.0, %v1838_v51  ;;  %s2611_s17 = scalar_lea.vmem %s2131_s29, 32  ;;  %p2616_p1 = scmp.lt.s32.totalorder %s2131_s29, %s2131_s29 }
0x1317   :  { %p2612_p0 = scmp.ne.s32.totalorder %s2131_s29, %s2611_s17  ;;  %p2617_p2 = scmp.lt.s32.totalorder %s2611_s17, %s2611_s17 }
0x1318   :  { %v1839_v56 = vmul.f32 %v1837_v53, %v1797_v54  ;;  %v1842_v62 = vmul.f32 %v1840_v55, %v1790_v57 }
0x1319   :  { %p2618_p3 = por %p2617_p2, %p2616_p1 }
0x131a   :  { %v1841_v59 = vadd.f32 1.0, %v1839_v56 }
0x131b   :  { %p2619_p4 = pnand %p2618_p3, %p2612_p0 }
0x131c   :  { %v1843_v30 = vmul.f32 %v1841_v59, %v1791_v58 }
0x131e   :  { %v1853_v4 = vpack.c.bf16 %v1843_v30, %v1842_v62 }
0x1320   :  { %2479 = vmatmul.mubr.msk.bf16.vlgmr.msra.gmra.mxu0 %vm977_vm8, %v1853_v4 }
0x13e0   :  { %v1923_v0 = vpop.f32.mrf.mxu0 }
0x13e1   :  { %v1924_v33 = vadd.f32 %v2226_v63, %v1923_v0 }
0x13e2   :  { %v2480_v1 = vpop.f32.mrf.mxu0 }
0x13e3   :  { %v1930_v44 = vadd.f32 %v1924_v33, %v3100_v60 }
0x13e4   :  { %v1926_v21 = vpop.f32.mrf.mxu0 }
0x13e5   :  { %v1927_v10 = vadd.f32 %v2226_v63, %v1926_v21  ;;  %v1936_v42 = vsel %vm102_vm0, %v1930_v44, 0.0 }
0x13e6   :  { %1937 = vadd.xlane.f32.xlu1 %v1936_v42  ;;  %v2481_v2 = vpop.f32.mrf.mxu0 }
0x13e7   :  { %v1931_v3 = vadd.f32 %v1927_v10, %v3102_v61  ;;  %v2537_v61 = vld [vmem:[%s3189_s16 + $0x8] sm:$0xff]  }
0x13e8   :  { %2483 = vmatpush3.bf16.msra.mxu1 %v2537_v61 }
0x13e9   :  { %v1939_v5 = vsel %vm102_vm0, %v1931_v3, 0.0  ;;  %2484 = vmatprep.subr.bf16.mxu1 %v2633_v15 }
0x13ea   :  { %1940 = vadd.xlane.f32.xlu0 %v1939_v5 }
0x13ec   :  { %2485 = vmatpush3.bf16.msra.mxu1 %v2538_v29 }
0x13ed   :  { %2490 = vmatprep.subr.bf16.mxu1 %v2633_v15 }
0x146f   :  { %v1938_v6 = vpop.xlane.xlu1 %1937 }
0x1470   :  { %v1942_v46 = vmul.f32 0.03125, %v1938_v6 }
0x1472   :  { %v1944_v38 = vsub.f32 %v1930_v44, %v1942_v46 }
0x1473   :  { %v1941_v7 = vpop.xlane.xlu0 %1940 }
0x1474   :  { %v1943_v8 = vmul.f32 0.03125, %v1941_v7  ;;  %v1946_v23 = vmul.f32 %v1944_v38, %v1944_v38 }
0x1476   :  { %v1945_v31 = vsub.f32 %v1931_v3, %v1943_v8  ;;  %v1948_v60 = vsel %vm102_vm0, %v1946_v23, 0.0 }
0x1477   :  { %1949 = vadd.xlane.f32.xlu1 %v1948_v60 }
0x1478   :  { %v1947_v9 = vmul.f32 %v1945_v31, %v1945_v31 }
0x147a   :  { %v1951_v11 = vsel %vm102_vm0, %v1947_v9, 0.0 }
0x147b   :  { %1952 = vadd.xlane.f32.xlu0 %v1951_v11 }
0x1500   :  { %v1950_v32 = vpop.xlane.xlu1 %1949 }
0x1501   :  { %v1954_v14 = vmul.f32 0.03125, %v1950_v32 }
0x1503   :  { %v1956_v16 = vadd.f32 1e-12, %v1954_v14 }
0x1504   :  { %v1953_v17 = vpop.xlane.xlu0 %1952 }
0x1505   :  { %2605 = vrsqrt.f32 %v1956_v16  ;;  %v1955_v18 = vmul.f32 0.03125, %v1953_v17 }
0x1507   :  { %v1957_v19 = vadd.f32 1e-12, %v1955_v18 }
0x1509   :  { %2607 = vrsqrt.f32 %v1957_v19 }
0x1512   :  { %v2606_v20 = vpop.eup %2605 }
0x1513   :  { %v1960_v24 = vmul.f32 %v2606_v20, %v1944_v38 }
0x1515   :  { %v1968_v25 = vmul.f32 %v2234_v22, %v1960_v24 }
0x1516   :  { %v2608_v27 = vpop.eup %2607 }
0x1517   :  { %v1961_v35 = vmul.f32 %v2608_v27, %v1945_v31  ;;  %v1976_v39 = vadd.f32 %v2235_v34, %v1968_v25 }
0x1519   :  { %v1969_v36 = vmul.f32 %v2234_v22, %v1961_v35  ;;  %v1982_v41 = vpack.c.bf16 %v1976_v39, %v1976_v39 }
0x151b   :  { %v1977_v40 = vadd.f32 %v2235_v34, %v1969_v36  ;;  %v1993_v47 = vunpack.c.l.b16 %v1982_v41 }
0x151d   :  { %v1983_v45 = vpack.c.bf16 %v1977_v40, %v1977_v40 }
0x151f   :  { %v1994_v12 = vunpack.c.l.b16 %v1983_v45 }
0x1521   :  { %v1995_v28 = vrot.slane %v1994_v12, 7 }
0x1523   :  { %v1997_v13 = vsel %vm1996_vm11, %v1995_v28, %v1993_v47 }
0x1524   :  { %v1998_v48 = vpack.c.b16 %v1997_v13, %v1997_v13 }
0x1526   :  { %2487 = vmatmul.mubr.msk.bf16.vlgmr.msra.gmra.mxu1 %vm102_vm0, %v1998_v48 }
0x1527   :  { %2494 = vmatprep.mubr.msk.bf16.mxu1 %vm2634_vm1, %v2633_v15  ;;  %2491 = vmatpush3.bf16.msra.mxu1 %v2539_v37 }
0x1528   :  { %2492 = vmatprep.subr.bf16.mxu1 %v2633_v15  ;;  %v2240_v15 = vld [vmem:[%s3192_s19] ss:$0 sm:$0xff] }
0x152b   :  { %2493 = vmatpush3.bf16.msra.mxu1 %v2540_v49 }
0x15e6   :  { %v2048_v43 = vpop.f32.mrf.mxu1 }
0x15e7   :  { %v2049_v50 = vadd.f32 %v2236_v26, %v2048_v43 }
0x15e8   :  { %v2488_v51 = vpop.f32.mrf.mxu1 }
0x15e9   :  { %2609 = vtanh.f32 %v2049_v50 }
0x15ea   :  { %v2051_v52 = vpop.f32.mrf.mxu1 }
0x15ec   :  { %v2489_v53 = vpop.f32.mrf.mxu1 }
0x15f6   :  { %v2610_v54 = vpop.eup %2609 }
0x15f7   :  { %v2059_v55 = vpack.c.bf16 %v2610_v54, %v2610_v54 }
0x15f9   :  { %2495 = vmatmul.mubr.msk.bf16.vlgmr.msra.gmra.mxu1 %vm102_vm0, %v2059_v55 }
0x16b9   :  { %v2116_v56 = vpop.f32.mrf.mxu1 }
0x16ba   :  { %v2117_v57 = vadd.f32 %v2240_v15, %v2116_v56 }
0x16bb   :  { %v2496_v58 = vpop.f32.mrf.mxu1 }
0x16bc   :  { %2123 = vst.msk [vmem:[#allocation2] sm:$0x3] %vm2122_vm12, %v2117_v57 }
0x16bd   :  { %v2119_v59 = vpop.f32.mrf.mxu1 }
0x16be   :  { %2622 = shalt.err (!%p2619_p4)
}
0x16bf   :  { %2133 = dma.vmem_to_hbm [thread:$0]  %s2131_s29, 32, %s3193_s20, [#allocation3]   ;;  %v2497_v62 = vpop.f32.mrf.mxu1 }
0x16c0   :  { %2631 = dma.done.wait [#allocation3], 32  }
0x16c1   :  { %2632 = vsyncadd [#allocation3], 4294967264 }
0x16c2   :  { %2137 = vsyncpa [#allocation3], 1 }

</bundles_post_ra>
